<compile_context>
chip_gen: v5e
topology: v5e:2x2
jax: 0.10.0
libtpu: 0.0.40
codegen_flags: <defaults>
</compile_context>

<pallas_src>
import functools

import jax
import jax.numpy as jnp
from jax.experimental import pallas as pl
from jax.experimental.pallas import tpu as pltpu

BN_EPS = 1e-5

_VMEM = pl.BlockSpec(memory_space=pltpu.MemorySpace.VMEM)


def _vmem_specs(n):
    return [pl.BlockSpec(memory_space=pltpu.MemorySpace.VMEM) for _ in range(n)]


# ----------------------------- Pallas kernels -----------------------------

def conv_bn_relu_pool_kernel(p0_ref, p1_ref, p2_ref, p3_ref, w_ref, g_ref, b_ref, o_ref):
    """Fused Conv2d + BatchNorm2d (train-mode batch stats) + ReLU + MaxPool2d(2,2).

    Inputs (transposed / lane-dense layout):
      p{0..3}_ref : (2, K, P)   bf16  im2col patches for the 4 pooling corners
                                       (axis 0 = Siamese branch, columns = (b,hp,wp))
      w_ref       : (Cout, K)   bf16  conv weight matrix
      g_ref/b_ref : (Cout, 1)   f32   BN gamma / beta
      o_ref       : (2, Cout, P) bf16 pooled activations
    """
    w = w_ref[...]
    gamma = g_ref[...]
    beta = b_ref[...]
    for s in range(o_ref.shape[0]):                       # unrolled: 2 branches
        # 4 MXU matmuls, one per pooling corner; f32 accumulation.
        ys = [jnp.dot(w, p_ref[s], preferred_element_type=jnp.float32)
              for p_ref in (p0_ref, p1_ref, p2_ref, p3_ref)]
        # BatchNorm batch statistics over ALL spatial positions of this branch
        # (the 4 corners together are exactly the full pre-pool feature map).
        inv_cnt = 1.0 / (4.0 * ys[0].shape[1])
        mean = sum(jnp.sum(y, axis=1, keepdims=True) for y in ys) * inv_cnt
        var = sum(jnp.sum((y - mean) ** 2, axis=1, keepdims=True) for y in ys) * inv_cnt
        scale = gamma * jax.lax.rsqrt(var + BN_EPS)
        shift = beta - mean * scale
        z = [y * scale + shift for y in ys]
        # max(relu(z_c)) == relu(max(z_c)); pool = elementwise max of 4 corners.
        pooled = jnp.maximum(jnp.maximum(z[0], z[1]), jnp.maximum(z[2], z[3]))
        o_ref[s, :, :] = jnp.maximum(pooled, 0.0).astype(o_ref.dtype)


def conv_bn_relu_kernel(p_ref, w_ref, g_ref, b_ref, o_ref):
    """Fused Conv2d + BatchNorm2d + ReLU (no pooling).  Same layout as above."""
    w = w_ref[...]
    gamma = g_ref[...]
    beta = b_ref[...]
    for s in range(o_ref.shape[0]):
        y = jnp.dot(w, p_ref[s], preferred_element_type=jnp.float32)
        mean = jnp.mean(y, axis=1, keepdims=True)
        var = jnp.mean((y - mean) ** 2, axis=1, keepdims=True)
        scale = gamma * jax.lax.rsqrt(var + BN_EPS)
        shift = beta - mean * scale
        o_ref[s, :, :] = jnp.maximum(y * scale + shift, 0.0).astype(o_ref.dtype)


def fc_siamese_kernel(x_ref, *refs):
    """Fused FC stack: per-branch fc[:-1] (Linear+Sigmoid), |f1-f2|, head Linear+Sigmoid.

      x_ref : (2, B, F) bf16 flattened CNN features (axis 0 = Siamese branch)
      refs  : (w1, b1, ..., wk, bk, w_head, b_head, o_ref)
              w_* bf16 (in_f, out_f), b_* f32 (1, out_f), o_ref f32 (B, 1)
    """
    o_ref = refs[-1]
    wb = refs[:-1]
    n_layers = len(wb) // 2
    feats = []
    for s in range(2):
        h = x_ref[s]                                   # (B, F) bf16
        for i in range(n_layers - 1):                  # fc[:-1]: Linear + Sigmoid
            w = wb[2 * i][...]
            b = wb[2 * i + 1][...]
            h = jax.nn.sigmoid(
                jnp.dot(h, w, preferred_element_type=jnp.float32) + b
            ).astype(jnp.bfloat16)
        feats.append(h.astype(jnp.float32))
    d = jnp.abs(feats[0] - feats[1]).astype(jnp.bfloat16)   # L1 distance
    w_head = wb[-2][...]
    b_head = wb[-1][...]
    o_ref[...] = jax.nn.sigmoid(
        jnp.dot(d, w_head, preferred_element_type=jnp.float32) + b_head)


# ----------------------------- kernel wrappers -----------------------------

def conv_bn_relu_pool(corners, w_t, gamma, beta):
    S, _, Pb = corners[0].shape
    cout = w_t.shape[0]
    return pl.pallas_call(
        conv_bn_relu_pool_kernel,
        out_shape=jax.ShapeDtypeStruct((S, cout, Pb), jnp.bfloat16),
        in_specs=_vmem_specs(7),
        out_specs=_VMEM,
    )(*corners, w_t, gamma, beta)


def conv_bn_relu(patches, w_t, gamma, beta):
    S, _, P = patches.shape
    cout = w_t.shape[0]
    return pl.pallas_call(
        conv_bn_relu_kernel,
        out_shape=jax.ShapeDtypeStruct((S, cout, P), jnp.bfloat16),
        in_specs=_vmem_specs(4),
        out_specs=_VMEM,
    )(patches, w_t, gamma, beta)


def fc_siamese_head(feat, fc_params):
    B = feat.shape[1]
    out_f = fc_params[-1]['w'].shape[1]
    args = [feat]
    for p in fc_params:
        args.extend([p['w'], p['b']])
    return pl.pallas_call(
        fc_siamese_kernel,
        out_shape=jax.ShapeDtypeStruct((B, out_f), jnp.float32),
        in_specs=_vmem_specs(len(args)),
        out_specs=_VMEM,
    )(*args)


# ----------------------------- glue (plain JAX) -----------------------------

def im2col_T(x, kh, kw, stride, pad):
    """x: (2, C, B, H, W) -> patches (2, kh*kw*C, B, Ho, Wo), rows in (i, j, c) order."""
    S, C, B, H, W = x.shape
    xp = jnp.pad(x, ((0, 0), (0, 0), (0, 0), (pad, pad), (pad, pad)))
    Ho = (H + 2 * pad - kh) // stride + 1
    Wo = (W + 2 * pad - kw) // stride + 1
    rows = []
    for i in range(kh):
        for j in range(kw):
            rows.append(xp[:, :, :, i:i + stride * Ho:stride, j:j + stride * Wo:stride])
    p = jnp.stack(rows, axis=1)                     # (2, kh*kw, C, B, Ho, Wo)
    return p.reshape(S, kh * kw * C, B, Ho, Wo), Ho, Wo


def cnn_block_forward(x, p, cfg):
    k, s, pad = cfg['kernel_size'], cfg['stride'], cfg['padding']
    S, _, B = x.shape[0], x.shape[1], x.shape[2]
    patches, Ho, Wo = im2col_T(x, k, k, s, pad)     # (2, K, B, Ho, Wo)
    patches = patches.astype(jnp.bfloat16)
    cout = p['w_t'].shape[0]
    if cfg['use_pooling']:
        Hp, Wp = Ho // 2, Wo // 2
        corners = [patches[:, :, :, di::2, dj::2].reshape(S, -1, B * Hp * Wp)
                   for di in (0, 1) for dj in (0, 1)]
        y = conv_bn_relu_pool(corners, p['w_t'], p['gamma'], p['beta'])
        return y.reshape(S, cout, B, Hp, Wp)
    y = conv_bn_relu(patches.reshape(S, -1, B * Ho * Wo),
                     p['w_t'], p['gamma'], p['beta'])
    return y.reshape(S, cout, B, Ho, Wo)


def siamese_forward(x1, x2, params, cnn_cfg):
    B = x1.shape[0]
    # Batch both Siamese branches into one pass; branch axis stays explicit so
    # BatchNorm batch stats remain per-branch (matches two __forward_once calls).
    x = jnp.stack([x1, x2], axis=0)                 # (2, B, C, H, W)  NCHW per branch
    x = jnp.transpose(x, (0, 2, 1, 3, 4))           # (2, C, B, H, W)  channel-major
    for cfg, p in zip(cnn_cfg, params['cnn']):
        x = cnn_block_forward(x, p, cfg)
    S, C, Bt, Hf, Wf = x.shape
    # torch.flatten(x, 1) on NCHW -> per-sample (c, h, w) order.
    feat = jnp.transpose(x, (0, 2, 1, 3, 4)).reshape(S, Bt, C * Hf * Wf)
    return fc_siamese_head(feat.astype(jnp.bfloat16), params['fc'])


# ----------------------------- parameter init -----------------------------

def init_params(key, cnn_cfg, fc_cfg):
    params = {'cnn': [], 'fc': []}
    in_ch = 1
    for cfg in cnn_cfg:
        key, kw = jax.random.split(key)
        cout, k = cfg['out_channels'], cfg['kernel_size']
        # nn.init.normal_(conv.weight, 0.0, 0.01); no conv bias (use_batchnorm=True).
        w = 0.01 * jax.random.normal(kw, (cout, in_ch, k, k), jnp.float32)
        # (Cout, Cin, kh, kw) -> (Cout, kh*kw*Cin) matching im2col (i, j, c) row order.
        w_t = jnp.transpose(w, (0, 2, 3, 1)).reshape(cout, k * k * in_ch)
        params['cnn'].append({
            'w_t': w_t.astype(jnp.bfloat16),
            'gamma': jnp.ones((cout, 1), jnp.float32),   # BN affine defaults
            'beta': jnp.zeros((cout, 1), jnp.float32),
        })
        in_ch = cout
    in_f = fc_cfg[0]['in_features']
    for cfg in fc_cfg:
        key, k1, k2 = jax.random.split(key, 3)
        out_f = cfg['out_features']
        # nn.init.normal_(linear.weight, 0.0, 0.2); bias ~ N(0.5, 0.01)
        w = 0.2 * jax.random.normal(k1, (out_f, in_f), jnp.float32)
        b = 0.5 + 0.01 * jax.random.normal(k2, (out_f,), jnp.float32)
        params['fc'].append({'w': jnp.transpose(w).astype(jnp.bfloat16),
                             'b': b.reshape(1, out_f)})
        in_f = out_f
    return params


# ----------------------------- main -----------------------------

if __name__ == "__main__":
    # Small synthetic configuration consistent with the module's constructor.
    cnn_cfg = [
        dict(out_channels=8, kernel_size=3, stride=1, padding=1, use_pooling=True),
        dict(out_channels=16, kernel_size=3, stride=1, padding=1, use_pooling=True),
    ]
    # 16x16 input -> (8, 8x8) -> (16, 4x4) -> flatten 256
    fc_cfg = [
        dict(in_features=16 * 4 * 4, out_features=32),
        dict(in_features=32, out_features=1),
    ]

    key = jax.random.PRNGKey(0)
    kp, kx1, kx2 = jax.random.split(key, 3)
    params = init_params(kp, cnn_cfg, fc_cfg)

    x1 = jax.random.normal(kx1, (2, 1, 16, 16), jnp.float32)
    x2 = jax.random.normal(kx2, (2, 1, 16, 16), jnp.float32)

    fwd = jax.jit(functools.partial(siamese_forward, cnn_cfg=cnn_cfg))
    out = jax.block_until_ready(fwd(x1, x2, params))

    assert out.shape == (2, 1), out.shape
    assert bool(jnp.all((out >= 0.0) & (out <= 1.0)))
    print("KERNEL_OK")
</pallas_src>

<mosaic_0001>
module attributes {stable_mosaic.version = 11 : i64} {
  func.func @conv_bn_relu_pool_kernel(%arg0: memref<2x9x128xbf16, #tpu.memory_space<vmem>>, %arg1: memref<2x9x128xbf16, #tpu.memory_space<vmem>>, %arg2: memref<2x9x128xbf16, #tpu.memory_space<vmem>>, %arg3: memref<2x9x128xbf16, #tpu.memory_space<vmem>>, %arg4: memref<8x9xbf16, #tpu.memory_space<vmem>>, %arg5: memref<8x1xf32, #tpu.memory_space<vmem>>, %arg6: memref<8x1xf32, #tpu.memory_space<vmem>>, %arg7: memref<2x8x128xbf16, #tpu.memory_space<vmem>>) attributes {dimension_semantics = [], scalar_prefetch = 0 : i64, scratch_operands = 0 : i64, tpu.core_type = #tpu.core_type<tc>} {
    %c0 = arith.constant 0 : index
    %c0_0 = arith.constant 0 : index
    %0 = vector.load %arg4[%c0, %c0_0] : memref<8x9xbf16, #tpu.memory_space<vmem>>, vector<8x9xbf16>
    %c0_1 = arith.constant 0 : index
    %c0_2 = arith.constant 0 : index
    %1 = vector.load %arg5[%c0_1, %c0_2] : memref<8x1xf32, #tpu.memory_space<vmem>>, vector<8x1xf32>
    %c0_3 = arith.constant 0 : index
    %c0_4 = arith.constant 0 : index
    %2 = vector.load %arg6[%c0_3, %c0_4] : memref<8x1xf32, #tpu.memory_space<vmem>>, vector<8x1xf32>
    %c0_5 = arith.constant 0 : index
    %c0_6 = arith.constant 0 : index
    %c0_7 = arith.constant 0 : index
    %3 = vector.load %arg0[%c0_5, %c0_6, %c0_7] : memref<2x9x128xbf16, #tpu.memory_space<vmem>>, vector<1x9x128xbf16>
    %4 = vector.shape_cast %3 : vector<1x9x128xbf16> to vector<9x128xbf16>
    %cst = arith.constant dense<0.000000e+00> : vector<8x128xf32>
    %5 = tpu.matmul %0, %4, %cst {dimension_numbers = #tpu.dot_dimension_numbers<[1], [0], [0], [1], [0, 0, 1, 1], [], []>} : vector<8x9xbf16>, vector<9x128xbf16>, vector<8x128xf32> -> vector<8x128xf32>
    %c0_8 = arith.constant 0 : index
    %c0_9 = arith.constant 0 : index
    %c0_10 = arith.constant 0 : index
    %6 = vector.load %arg1[%c0_8, %c0_9, %c0_10] : memref<2x9x128xbf16, #tpu.memory_space<vmem>>, vector<1x9x128xbf16>
    %7 = vector.shape_cast %6 : vector<1x9x128xbf16> to vector<9x128xbf16>
    %cst_11 = arith.constant dense<0.000000e+00> : vector<8x128xf32>
    %8 = tpu.matmul %0, %7, %cst_11 {dimension_numbers = #tpu.dot_dimension_numbers<[1], [0], [0], [1], [0, 0, 1, 1], [], []>} : vector<8x9xbf16>, vector<9x128xbf16>, vector<8x128xf32> -> vector<8x128xf32>
    %c0_12 = arith.constant 0 : index
    %c0_13 = arith.constant 0 : index
    %c0_14 = arith.constant 0 : index
    %9 = vector.load %arg2[%c0_12, %c0_13, %c0_14] : memref<2x9x128xbf16, #tpu.memory_space<vmem>>, vector<1x9x128xbf16>
    %10 = vector.shape_cast %9 : vector<1x9x128xbf16> to vector<9x128xbf16>
    %cst_15 = arith.constant dense<0.000000e+00> : vector<8x128xf32>
    %11 = tpu.matmul %0, %10, %cst_15 {dimension_numbers = #tpu.dot_dimension_numbers<[1], [0], [0], [1], [0, 0, 1, 1], [], []>} : vector<8x9xbf16>, vector<9x128xbf16>, vector<8x128xf32> -> vector<8x128xf32>
    %c0_16 = arith.constant 0 : index
    %c0_17 = arith.constant 0 : index
    %c0_18 = arith.constant 0 : index
    %12 = vector.load %arg3[%c0_16, %c0_17, %c0_18] : memref<2x9x128xbf16, #tpu.memory_space<vmem>>, vector<1x9x128xbf16>
    %13 = vector.shape_cast %12 : vector<1x9x128xbf16> to vector<9x128xbf16>
    %cst_19 = arith.constant dense<0.000000e+00> : vector<8x128xf32>
    %14 = tpu.matmul %0, %13, %cst_19 {dimension_numbers = #tpu.dot_dimension_numbers<[1], [0], [0], [1], [0, 0, 1, 1], [], []>} : vector<8x9xbf16>, vector<9x128xbf16>, vector<8x128xf32> -> vector<8x128xf32>
    %cst_20 = arith.constant dense<0.000000e+00> : vector<8xf32>
    %15 = vector.multi_reduction <add>, %5, %cst_20 [1] : vector<8x128xf32> to vector<8xf32>
    %16 = vector.shape_cast %15 : vector<8xf32> to vector<8x1xf32>
    %cst_21 = arith.constant 0.000000e+00 : f32
    %17 = vector.broadcast %cst_21 : f32 to vector<8x1xf32>
    %18 = arith.addf %17, %16 : vector<8x1xf32>
    %cst_22 = arith.constant dense<0.000000e+00> : vector<8xf32>
    %19 = vector.multi_reduction <add>, %8, %cst_22 [1] : vector<8x128xf32> to vector<8xf32>
    %20 = vector.shape_cast %19 : vector<8xf32> to vector<8x1xf32>
    %21 = arith.addf %18, %20 : vector<8x1xf32>
    %cst_23 = arith.constant dense<0.000000e+00> : vector<8xf32>
    %22 = vector.multi_reduction <add>, %11, %cst_23 [1] : vector<8x128xf32> to vector<8xf32>
    %23 = vector.shape_cast %22 : vector<8xf32> to vector<8x1xf32>
    %24 = arith.addf %21, %23 : vector<8x1xf32>
    %cst_24 = arith.constant dense<0.000000e+00> : vector<8xf32>
    %25 = vector.multi_reduction <add>, %14, %cst_24 [1] : vector<8x128xf32> to vector<8xf32>
    %26 = vector.shape_cast %25 : vector<8xf32> to vector<8x1xf32>
    %27 = arith.addf %24, %26 : vector<8x1xf32>
    %cst_25 = arith.constant 0.001953125 : f32
    %28 = vector.broadcast %cst_25 : f32 to vector<8x1xf32>
    %29 = arith.mulf %27, %28 : vector<8x1xf32>
    %30 = vector.broadcast %29 : vector<8x1xf32> to vector<8x128xf32>
    %31 = arith.subf %5, %30 : vector<8x128xf32>
    %32 = arith.mulf %31, %31 : vector<8x128xf32>
    %cst_26 = arith.constant dense<0.000000e+00> : vector<8xf32>
    %33 = vector.multi_reduction <add>, %32, %cst_26 [1] : vector<8x128xf32> to vector<8xf32>
    %34 = vector.shape_cast %33 : vector<8xf32> to vector<8x1xf32>
    %cst_27 = arith.constant 0.000000e+00 : f32
    %35 = vector.broadcast %cst_27 : f32 to vector<8x1xf32>
    %36 = arith.addf %35, %34 : vector<8x1xf32>
    %37 = vector.broadcast %29 : vector<8x1xf32> to vector<8x128xf32>
    %38 = arith.subf %8, %37 : vector<8x128xf32>
    %39 = arith.mulf %38, %38 : vector<8x128xf32>
    %cst_28 = arith.constant dense<0.000000e+00> : vector<8xf32>
    %40 = vector.multi_reduction <add>, %39, %cst_28 [1] : vector<8x128xf32> to vector<8xf32>
    %41 = vector.shape_cast %40 : vector<8xf32> to vector<8x1xf32>
    %42 = arith.addf %36, %41 : vector<8x1xf32>
    %43 = vector.broadcast %29 : vector<8x1xf32> to vector<8x128xf32>
    %44 = arith.subf %11, %43 : vector<8x128xf32>
    %45 = arith.mulf %44, %44 : vector<8x128xf32>
    %cst_29 = arith.constant dense<0.000000e+00> : vector<8xf32>
    %46 = vector.multi_reduction <add>, %45, %cst_29 [1] : vector<8x128xf32> to vector<8xf32>
    %47 = vector.shape_cast %46 : vector<8xf32> to vector<8x1xf32>
    %48 = arith.addf %42, %47 : vector<8x1xf32>
    %49 = vector.broadcast %29 : vector<8x1xf32> to vector<8x128xf32>
    %50 = arith.subf %14, %49 : vector<8x128xf32>
    %51 = arith.mulf %50, %50 : vector<8x128xf32>
    %cst_30 = arith.constant dense<0.000000e+00> : vector<8xf32>
    %52 = vector.multi_reduction <add>, %51, %cst_30 [1] : vector<8x128xf32> to vector<8xf32>
    %53 = vector.shape_cast %52 : vector<8xf32> to vector<8x1xf32>
    %54 = arith.addf %48, %53 : vector<8x1xf32>
    %cst_31 = arith.constant 0.001953125 : f32
    %55 = vector.broadcast %cst_31 : f32 to vector<8x1xf32>
    %56 = arith.mulf %54, %55 : vector<8x1xf32>
    %cst_32 = arith.constant 9.99999974E-6 : f32
    %57 = vector.broadcast %cst_32 : f32 to vector<8x1xf32>
    %58 = arith.addf %56, %57 : vector<8x1xf32>
    %59 = math.rsqrt %58 : vector<8x1xf32>
    %60 = arith.mulf %1, %59 : vector<8x1xf32>
    %61 = arith.mulf %29, %60 : vector<8x1xf32>
    %62 = arith.subf %2, %61 : vector<8x1xf32>
    %63 = vector.broadcast %60 : vector<8x1xf32> to vector<8x128xf32>
    %64 = arith.mulf %5, %63 : vector<8x128xf32>
    %65 = vector.broadcast %62 : vector<8x1xf32> to vector<8x128xf32>
    %66 = arith.addf %64, %65 : vector<8x128xf32>
    %67 = vector.broadcast %60 : vector<8x1xf32> to vector<8x128xf32>
    %68 = arith.mulf %8, %67 : vector<8x128xf32>
    %69 = vector.broadcast %62 : vector<8x1xf32> to vector<8x128xf32>
    %70 = arith.addf %68, %69 : vector<8x128xf32>
    %71 = vector.broadcast %60 : vector<8x1xf32> to vector<8x128xf32>
    %72 = arith.mulf %11, %71 : vector<8x128xf32>
    %73 = vector.broadcast %62 : vector<8x1xf32> to vector<8x128xf32>
    %74 = arith.addf %72, %73 : vector<8x128xf32>
    %75 = vector.broadcast %60 : vector<8x1xf32> to vector<8x128xf32>
    %76 = arith.mulf %14, %75 : vector<8x128xf32>
    %77 = vector.broadcast %62 : vector<8x1xf32> to vector<8x128xf32>
    %78 = arith.addf %76, %77 : vector<8x128xf32>
    %79 = arith.maximumf %66, %70 : vector<8x128xf32>
    %80 = arith.maximumf %74, %78 : vector<8x128xf32>
    %81 = arith.maximumf %79, %80 : vector<8x128xf32>
    %cst_33 = arith.constant 0.000000e+00 : f32
    %82 = vector.broadcast %cst_33 : f32 to vector<8x128xf32>
    %83 = arith.maximumf %81, %82 : vector<8x128xf32>
    %84 = arith.truncf %83 : vector<8x128xf32> to vector<8x128xbf16>
    %c0_34 = arith.constant 0 : index
    %c0_35 = arith.constant 0 : index
    %c0_36 = arith.constant 0 : index
    %85 = vector.load %arg7[%c0_34, %c0_35, %c0_36] : memref<2x8x128xbf16, #tpu.memory_space<vmem>>, vector<1x8x128xbf16>
    %86 = vector.shape_cast %85 : vector<1x8x128xbf16> to vector<8x128xbf16>
    %87 = vector.shape_cast %84 : vector<8x128xbf16> to vector<1x8x128xbf16>
    tpu.vector_store %arg7[%c0_34, %c0_35, %c0_36], %87 {strides = array<i32>} : memref<2x8x128xbf16, #tpu.memory_space<vmem>>, vector<1x8x128xbf16>,
    %c1 = arith.constant 1 : index
    %c0_37 = arith.constant 0 : index
    %c0_38 = arith.constant 0 : index
    %88 = vector.load %arg0[%c1, %c0_37, %c0_38] : memref<2x9x128xbf16, #tpu.memory_space<vmem>>, vector<1x9x128xbf16>
    %89 = vector.shape_cast %88 : vector<1x9x128xbf16> to vector<9x128xbf16>
    %cst_39 = arith.constant dense<0.000000e+00> : vector<8x128xf32>
    %90 = tpu.matmul %0, %89, %cst_39 {dimension_numbers = #tpu.dot_dimension_numbers<[1], [0], [0], [1], [0, 0, 1, 1], [], []>} : vector<8x9xbf16>, vector<9x128xbf16>, vector<8x128xf32> -> vector<8x128xf32>
    %c1_40 = arith.constant 1 : index
    %c0_41 = arith.constant 0 : index
    %c0_42 = arith.constant 0 : index
    %91 = vector.load %arg1[%c1_40, %c0_41, %c0_42] : memref<2x9x128xbf16, #tpu.memory_space<vmem>>, vector<1x9x128xbf16>
    %92 = vector.shape_cast %91 : vector<1x9x128xbf16> to vector<9x128xbf16>
    %cst_43 = arith.constant dense<0.000000e+00> : vector<8x128xf32>
    %93 = tpu.matmul %0, %92, %cst_43 {dimension_numbers = #tpu.dot_dimension_numbers<[1], [0], [0], [1], [0, 0, 1, 1], [], []>} : vector<8x9xbf16>, vector<9x128xbf16>, vector<8x128xf32> -> vector<8x128xf32>
    %c1_44 = arith.constant 1 : index
    %c0_45 = arith.constant 0 : index
    %c0_46 = arith.constant 0 : index
    %94 = vector.load %arg2[%c1_44, %c0_45, %c0_46] : memref<2x9x128xbf16, #tpu.memory_space<vmem>>, vector<1x9x128xbf16>
    %95 = vector.shape_cast %94 : vector<1x9x128xbf16> to vector<9x128xbf16>
    %cst_47 = arith.constant dense<0.000000e+00> : vector<8x128xf32>
    %96 = tpu.matmul %0, %95, %cst_47 {dimension_numbers = #tpu.dot_dimension_numbers<[1], [0], [0], [1], [0, 0, 1, 1], [], []>} : vector<8x9xbf16>, vector<9x128xbf16>, vector<8x128xf32> -> vector<8x128xf32>
    %c1_48 = arith.constant 1 : index
    %c0_49 = arith.constant 0 : index
    %c0_50 = arith.constant 0 : index
    %97 = vector.load %arg3[%c1_48, %c0_49, %c0_50] : memref<2x9x128xbf16, #tpu.memory_space<vmem>>, vector<1x9x128xbf16>
    %98 = vector.shape_cast %97 : vector<1x9x128xbf16> to vector<9x128xbf16>
    %cst_51 = arith.constant dense<0.000000e+00> : vector<8x128xf32>
    %99 = tpu.matmul %0, %98, %cst_51 {dimension_numbers = #tpu.dot_dimension_numbers<[1], [0], [0], [1], [0, 0, 1, 1], [], []>} : vector<8x9xbf16>, vector<9x128xbf16>, vector<8x128xf32> -> vector<8x128xf32>
    %cst_52 = arith.constant dense<0.000000e+00> : vector<8xf32>
    %100 = vector.multi_reduction <add>, %90, %cst_52 [1] : vector<8x128xf32> to vector<8xf32>
    %101 = vector.shape_cast %100 : vector<8xf32> to vector<8x1xf32>
    %cst_53 = arith.constant 0.000000e+00 : f32
    %102 = vector.broadcast %cst_53 : f32 to vector<8x1xf32>
    %103 = arith.addf %102, %101 : vector<8x1xf32>
    %cst_54 = arith.constant dense<0.000000e+00> : vector<8xf32>
    %104 = vector.multi_reduction <add>, %93, %cst_54 [1] : vector<8x128xf32> to vector<8xf32>
    %105 = vector.shape_cast %104 : vector<8xf32> to vector<8x1xf32>
    %106 = arith.addf %103, %105 : vector<8x1xf32>
    %cst_55 = arith.constant dense<0.000000e+00> : vector<8xf32>
    %107 = vector.multi_reduction <add>, %96, %cst_55 [1] : vector<8x128xf32> to vector<8xf32>
    %108 = vector.shape_cast %107 : vector<8xf32> to vector<8x1xf32>
    %109 = arith.addf %106, %108 : vector<8x1xf32>
    %cst_56 = arith.constant dense<0.000000e+00> : vector<8xf32>
    %110 = vector.multi_reduction <add>, %99, %cst_56 [1] : vector<8x128xf32> to vector<8xf32>
    %111 = vector.shape_cast %110 : vector<8xf32> to vector<8x1xf32>
    %112 = arith.addf %109, %111 : vector<8x1xf32>
    %cst_57 = arith.constant 0.001953125 : f32
    %113 = vector.broadcast %cst_57 : f32 to vector<8x1xf32>
    %114 = arith.mulf %112, %113 : vector<8x1xf32>
    %115 = vector.broadcast %114 : vector<8x1xf32> to vector<8x128xf32>
    %116 = arith.subf %90, %115 : vector<8x128xf32>
    %117 = arith.mulf %116, %116 : vector<8x128xf32>
    %cst_58 = arith.constant dense<0.000000e+00> : vector<8xf32>
    %118 = vector.multi_reduction <add>, %117, %cst_58 [1] : vector<8x128xf32> to vector<8xf32>
    %119 = vector.shape_cast %118 : vector<8xf32> to vector<8x1xf32>
    %cst_59 = arith.constant 0.000000e+00 : f32
    %120 = vector.broadcast %cst_59 : f32 to vector<8x1xf32>
    %121 = arith.addf %120, %119 : vector<8x1xf32>
    %122 = vector.broadcast %114 : vector<8x1xf32> to vector<8x128xf32>
    %123 = arith.subf %93, %122 : vector<8x128xf32>
    %124 = arith.mulf %123, %123 : vector<8x128xf32>
    %cst_60 = arith.constant dense<0.000000e+00> : vector<8xf32>
    %125 = vector.multi_reduction <add>, %124, %cst_60 [1] : vector<8x128xf32> to vector<8xf32>
    %126 = vector.shape_cast %125 : vector<8xf32> to vector<8x1xf32>
    %127 = arith.addf %121, %126 : vector<8x1xf32>
    %128 = vector.broadcast %114 : vector<8x1xf32> to vector<8x128xf32>
    %129 = arith.subf %96, %128 : vector<8x128xf32>
    %130 = arith.mulf %129, %129 : vector<8x128xf32>
    %cst_61 = arith.constant dense<0.000000e+00> : vector<8xf32>
    %131 = vector.multi_reduction <add>, %130, %cst_61 [1] : vector<8x128xf32> to vector<8xf32>
    %132 = vector.shape_cast %131 : vector<8xf32> to vector<8x1xf32>
    %133 = arith.addf %127, %132 : vector<8x1xf32>
    %134 = vector.broadcast %114 : vector<8x1xf32> to vector<8x128xf32>
    %135 = arith.subf %99, %134 : vector<8x128xf32>
    %136 = arith.mulf %135, %135 : vector<8x128xf32>
    %cst_62 = arith.constant dense<0.000000e+00> : vector<8xf32>
    %137 = vector.multi_reduction <add>, %136, %cst_62 [1] : vector<8x128xf32> to vector<8xf32>
    %138 = vector.shape_cast %137 : vector<8xf32> to vector<8x1xf32>
    %139 = arith.addf %133, %138 : vector<8x1xf32>
    %cst_63 = arith.constant 0.001953125 : f32
    %140 = vector.broadcast %cst_63 : f32 to vector<8x1xf32>
    %141 = arith.mulf %139, %140 : vector<8x1xf32>
    %cst_64 = arith.constant 9.99999974E-6 : f32
    %142 = vector.broadcast %cst_64 : f32 to vector<8x1xf32>
    %143 = arith.addf %141, %142 : vector<8x1xf32>
    %144 = math.rsqrt %143 : vector<8x1xf32>
    %145 = arith.mulf %1, %144 : vector<8x1xf32>
    %146 = arith.mulf %114, %145 : vector<8x1xf32>
    %147 = arith.subf %2, %146 : vector<8x1xf32>
    %148 = vector.broadcast %145 : vector<8x1xf32> to vector<8x128xf32>
    %149 = arith.mulf %90, %148 : vector<8x128xf32>
    %150 = vector.broadcast %147 : vector<8x1xf32> to vector<8x128xf32>
    %151 = arith.addf %149, %150 : vector<8x128xf32>
    %152 = vector.broadcast %145 : vector<8x1xf32> to vector<8x128xf32>
    %153 = arith.mulf %93, %152 : vector<8x128xf32>
    %154 = vector.broadcast %147 : vector<8x1xf32> to vector<8x128xf32>
    %155 = arith.addf %153, %154 : vector<8x128xf32>
    %156 = vector.broadcast %145 : vector<8x1xf32> to vector<8x128xf32>
    %157 = arith.mulf %96, %156 : vector<8x128xf32>
    %158 = vector.broadcast %147 : vector<8x1xf32> to vector<8x128xf32>
    %159 = arith.addf %157, %158 : vector<8x128xf32>
    %160 = vector.broadcast %145 : vector<8x1xf32> to vector<8x128xf32>
    %161 = arith.mulf %99, %160 : vector<8x128xf32>
    %162 = vector.broadcast %147 : vector<8x1xf32> to vector<8x128xf32>
    %163 = arith.addf %161, %162 : vector<8x128xf32>
    %164 = arith.maximumf %151, %155 : vector<8x128xf32>
    %165 = arith.maximumf %159, %163 : vector<8x128xf32>
    %166 = arith.maximumf %164, %165 : vector<8x128xf32>
    %cst_65 = arith.constant 0.000000e+00 : f32
    %167 = vector.broadcast %cst_65 : f32 to vector<8x128xf32>
    %168 = arith.maximumf %166, %167 : vector<8x128xf32>
    %169 = arith.truncf %168 : vector<8x128xf32> to vector<8x128xbf16>
    %c1_66 = arith.constant 1 : index
    %c0_67 = arith.constant 0 : index
    %c0_68 = arith.constant 0 : index
    %170 = vector.load %arg7[%c1_66, %c0_67, %c0_68] : memref<2x8x128xbf16, #tpu.memory_space<vmem>>, vector<1x8x128xbf16>
    %171 = vector.shape_cast %170 : vector<1x8x128xbf16> to vector<8x128xbf16>
    %172 = vector.shape_cast %169 : vector<8x128xbf16> to vector<1x8x128xbf16>
    tpu.vector_store %arg7[%c1_66, %c0_67, %c0_68], %172 {strides = array<i32>} : memref<2x8x128xbf16, #tpu.memory_space<vmem>>, vector<1x8x128xbf16>,
    return
  }
}

module attributes {stable_mosaic.version = 11 : i64} {
  func.func @conv_bn_relu_pool_kernel(%arg0: memref<2x72x32xbf16, #tpu.memory_space<vmem>>, %arg1: memref<2x72x32xbf16, #tpu.memory_space<vmem>>, %arg2: memref<2x72x32xbf16, #tpu.memory_space<vmem>>, %arg3: memref<2x72x32xbf16, #tpu.memory_space<vmem>>, %arg4: memref<16x72xbf16, #tpu.memory_space<vmem>>, %arg5: memref<16x1xf32, #tpu.memory_space<vmem>>, %arg6: memref<16x1xf32, #tpu.memory_space<vmem>>, %arg7: memref<2x16x32xbf16, #tpu.memory_space<vmem>>) attributes {dimension_semantics = [], scalar_prefetch = 0 : i64, scratch_operands = 0 : i64, tpu.core_type = #tpu.core_type<tc>} {
    %c0 = arith.constant 0 : index
    %c0_0 = arith.constant 0 : index
    %0 = vector.load %arg4[%c0, %c0_0] : memref<16x72xbf16, #tpu.memory_space<vmem>>, vector<16x72xbf16>
    %c0_1 = arith.constant 0 : index
    %c0_2 = arith.constant 0 : index
    %1 = vector.load %arg5[%c0_1, %c0_2] : memref<16x1xf32, #tpu.memory_space<vmem>>, vector<16x1xf32>
    %c0_3 = arith.constant 0 : index
    %c0_4 = arith.constant 0 : index
    %2 = vector.load %arg6[%c0_3, %c0_4] : memref<16x1xf32, #tpu.memory_space<vmem>>, vector<16x1xf32>
    %c0_5 = arith.constant 0 : index
    %c0_6 = arith.constant 0 : index
    %c0_7 = arith.constant 0 : index
    %3 = vector.load %arg0[%c0_5, %c0_6, %c0_7] : memref<2x72x32xbf16, #tpu.memory_space<vmem>>, vector<1x72x32xbf16>
    %4 = vector.shape_cast %3 : vector<1x72x32xbf16> to vector<72x32xbf16>
    %cst = arith.constant dense<0.000000e+00> : vector<16x32xf32>
    %5 = tpu.matmul %0, %4, %cst {dimension_numbers = #tpu.dot_dimension_numbers<[1], [0], [0], [1], [0, 0, 1, 1], [], []>} : vector<16x72xbf16>, vector<72x32xbf16>, vector<16x32xf32> -> vector<16x32xf32>
    %c0_8 = arith.constant 0 : index
    %c0_9 = arith.constant 0 : index
    %c0_10 = arith.constant 0 : index
    %6 = vector.load %arg1[%c0_8, %c0_9, %c0_10] : memref<2x72x32xbf16, #tpu.memory_space<vmem>>, vector<1x72x32xbf16>
    %7 = vector.shape_cast %6 : vector<1x72x32xbf16> to vector<72x32xbf16>
    %cst_11 = arith.constant dense<0.000000e+00> : vector<16x32xf32>
    %8 = tpu.matmul %0, %7, %cst_11 {dimension_numbers = #tpu.dot_dimension_numbers<[1], [0], [0], [1], [0, 0, 1, 1], [], []>} : vector<16x72xbf16>, vector<72x32xbf16>, vector<16x32xf32> -> vector<16x32xf32>
    %c0_12 = arith.constant 0 : index
    %c0_13 = arith.constant 0 : index
    %c0_14 = arith.constant 0 : index
    %9 = vector.load %arg2[%c0_12, %c0_13, %c0_14] : memref<2x72x32xbf16, #tpu.memory_space<vmem>>, vector<1x72x32xbf16>
    %10 = vector.shape_cast %9 : vector<1x72x32xbf16> to vector<72x32xbf16>
    %cst_15 = arith.constant dense<0.000000e+00> : vector<16x32xf32>
    %11 = tpu.matmul %0, %10, %cst_15 {dimension_numbers = #tpu.dot_dimension_numbers<[1], [0], [0], [1], [0, 0, 1, 1], [], []>} : vector<16x72xbf16>, vector<72x32xbf16>, vector<16x32xf32> -> vector<16x32xf32>
    %c0_16 = arith.constant 0 : index
    %c0_17 = arith.constant 0 : index
    %c0_18 = arith.constant 0 : index
    %12 = vector.load %arg3[%c0_16, %c0_17, %c0_18] : memref<2x72x32xbf16, #tpu.memory_space<vmem>>, vector<1x72x32xbf16>
    %13 = vector.shape_cast %12 : vector<1x72x32xbf16> to vector<72x32xbf16>
    %cst_19 = arith.constant dense<0.000000e+00> : vector<16x32xf32>
    %14 = tpu.matmul %0, %13, %cst_19 {dimension_numbers = #tpu.dot_dimension_numbers<[1], [0], [0], [1], [0, 0, 1, 1], [], []>} : vector<16x72xbf16>, vector<72x32xbf16>, vector<16x32xf32> -> vector<16x32xf32>
    %cst_20 = arith.constant dense<0.000000e+00> : vector<16xf32>
    %15 = vector.multi_reduction <add>, %5, %cst_20 [1] : vector<16x32xf32> to vector<16xf32>
    %16 = vector.shape_cast %15 : vector<16xf32> to vector<16x1xf32>
    %cst_21 = arith.constant 0.000000e+00 : f32
    %17 = vector.broadcast %cst_21 : f32 to vector<16x1xf32>
    %18 = arith.addf %17, %16 : vector<16x1xf32>
    %cst_22 = arith.constant dense<0.000000e+00> : vector<16xf32>
    %19 = vector.multi_reduction <add>, %8, %cst_22 [1] : vector<16x32xf32> to vector<16xf32>
    %20 = vector.shape_cast %19 : vector<16xf32> to vector<16x1xf32>
    %21 = arith.addf %18, %20 : vector<16x1xf32>
    %cst_23 = arith.constant dense<0.000000e+00> : vector<16xf32>
    %22 = vector.multi_reduction <add>, %11, %cst_23 [1] : vector<16x32xf32> to vector<16xf32>
    %23 = vector.shape_cast %22 : vector<16xf32> to vector<16x1xf32>
    %24 = arith.addf %21, %23 : vector<16x1xf32>
    %cst_24 = arith.constant dense<0.000000e+00> : vector<16xf32>
    %25 = vector.multi_reduction <add>, %14, %cst_24 [1] : vector<16x32xf32> to vector<16xf32>
    %26 = vector.shape_cast %25 : vector<16xf32> to vector<16x1xf32>
    %27 = arith.addf %24, %26 : vector<16x1xf32>
    %cst_25 = arith.constant 7.812500e-03 : f32
    %28 = vector.broadcast %cst_25 : f32 to vector<16x1xf32>
    %29 = arith.mulf %27, %28 : vector<16x1xf32>
    %30 = vector.broadcast %29 : vector<16x1xf32> to vector<16x32xf32>
    %31 = arith.subf %5, %30 : vector<16x32xf32>
    %32 = arith.mulf %31, %31 : vector<16x32xf32>
    %cst_26 = arith.constant dense<0.000000e+00> : vector<16xf32>
    %33 = vector.multi_reduction <add>, %32, %cst_26 [1] : vector<16x32xf32> to vector<16xf32>
    %34 = vector.shape_cast %33 : vector<16xf32> to vector<16x1xf32>
    %cst_27 = arith.constant 0.000000e+00 : f32
    %35 = vector.broadcast %cst_27 : f32 to vector<16x1xf32>
    %36 = arith.addf %35, %34 : vector<16x1xf32>
    %37 = vector.broadcast %29 : vector<16x1xf32> to vector<16x32xf32>
    %38 = arith.subf %8, %37 : vector<16x32xf32>
    %39 = arith.mulf %38, %38 : vector<16x32xf32>
    %cst_28 = arith.constant dense<0.000000e+00> : vector<16xf32>
    %40 = vector.multi_reduction <add>, %39, %cst_28 [1] : vector<16x32xf32> to vector<16xf32>
    %41 = vector.shape_cast %40 : vector<16xf32> to vector<16x1xf32>
    %42 = arith.addf %36, %41 : vector<16x1xf32>
    %43 = vector.broadcast %29 : vector<16x1xf32> to vector<16x32xf32>
    %44 = arith.subf %11, %43 : vector<16x32xf32>
    %45 = arith.mulf %44, %44 : vector<16x32xf32>
    %cst_29 = arith.constant dense<0.000000e+00> : vector<16xf32>
    %46 = vector.multi_reduction <add>, %45, %cst_29 [1] : vector<16x32xf32> to vector<16xf32>
    %47 = vector.shape_cast %46 : vector<16xf32> to vector<16x1xf32>
    %48 = arith.addf %42, %47 : vector<16x1xf32>
    %49 = vector.broadcast %29 : vector<16x1xf32> to vector<16x32xf32>
    %50 = arith.subf %14, %49 : vector<16x32xf32>
    %51 = arith.mulf %50, %50 : vector<16x32xf32>
    %cst_30 = arith.constant dense<0.000000e+00> : vector<16xf32>
    %52 = vector.multi_reduction <add>, %51, %cst_30 [1] : vector<16x32xf32> to vector<16xf32>
    %53 = vector.shape_cast %52 : vector<16xf32> to vector<16x1xf32>
    %54 = arith.addf %48, %53 : vector<16x1xf32>
    %cst_31 = arith.constant 7.812500e-03 : f32
    %55 = vector.broadcast %cst_31 : f32 to vector<16x1xf32>
    %56 = arith.mulf %54, %55 : vector<16x1xf32>
    %cst_32 = arith.constant 9.99999974E-6 : f32
    %57 = vector.broadcast %cst_32 : f32 to vector<16x1xf32>
    %58 = arith.addf %56, %57 : vector<16x1xf32>
    %59 = math.rsqrt %58 : vector<16x1xf32>
    %60 = arith.mulf %1, %59 : vector<16x1xf32>
    %61 = arith.mulf %29, %60 : vector<16x1xf32>
    %62 = arith.subf %2, %61 : vector<16x1xf32>
    %63 = vector.broadcast %60 : vector<16x1xf32> to vector<16x32xf32>
    %64 = arith.mulf %5, %63 : vector<16x32xf32>
    %65 = vector.broadcast %62 : vector<16x1xf32> to vector<16x32xf32>
    %66 = arith.addf %64, %65 : vector<16x32xf32>
    %67 = vector.broadcast %60 : vector<16x1xf32> to vector<16x32xf32>
    %68 = arith.mulf %8, %67 : vector<16x32xf32>
    %69 = vector.broadcast %62 : vector<16x1xf32> to vector<16x32xf32>
    %70 = arith.addf %68, %69 : vector<16x32xf32>
    %71 = vector.broadcast %60 : vector<16x1xf32> to vector<16x32xf32>
    %72 = arith.mulf %11, %71 : vector<16x32xf32>
    %73 = vector.broadcast %62 : vector<16x1xf32> to vector<16x32xf32>
    %74 = arith.addf %72, %73 : vector<16x32xf32>
    %75 = vector.broadcast %60 : vector<16x1xf32> to vector<16x32xf32>
    %76 = arith.mulf %14, %75 : vector<16x32xf32>
    %77 = vector.broadcast %62 : vector<16x1xf32> to vector<16x32xf32>
    %78 = arith.addf %76, %77 : vector<16x32xf32>
    %79 = arith.maximumf %66, %70 : vector<16x32xf32>
    %80 = arith.maximumf %74, %78 : vector<16x32xf32>
    %81 = arith.maximumf %79, %80 : vector<16x32xf32>
    %cst_33 = arith.constant 0.000000e+00 : f32
    %82 = vector.broadcast %cst_33 : f32 to vector<16x32xf32>
    %83 = arith.maximumf %81, %82 : vector<16x32xf32>
    %84 = arith.truncf %83 : vector<16x32xf32> to vector<16x32xbf16>
    %c0_34 = arith.constant 0 : index
    %c0_35 = arith.constant 0 : index
    %c0_36 = arith.constant 0 : index
    %85 = vector.load %arg7[%c0_34, %c0_35, %c0_36] : memref<2x16x32xbf16, #tpu.memory_space<vmem>>, vector<1x16x32xbf16>
    %86 = vector.shape_cast %85 : vector<1x16x32xbf16> to vector<16x32xbf16>
    %87 = vector.shape_cast %84 : vector<16x32xbf16> to vector<1x16x32xbf16>
    tpu.vector_store %arg7[%c0_34, %c0_35, %c0_36], %87 {strides = array<i32>} : memref<2x16x32xbf16, #tpu.memory_space<vmem>>, vector<1x16x32xbf16>,
    %c1 = arith.constant 1 : index
    %c0_37 = arith.constant 0 : index
    %c0_38 = arith.constant 0 : index
    %88 = vector.load %arg0[%c1, %c0_37, %c0_38] : memref<2x72x32xbf16, #tpu.memory_space<vmem>>, vector<1x72x32xbf16>
    %89 = vector.shape_cast %88 : vector<1x72x32xbf16> to vector<72x32xbf16>
    %cst_39 = arith.constant dense<0.000000e+00> : vector<16x32xf32>
    %90 = tpu.matmul %0, %89, %cst_39 {dimension_numbers = #tpu.dot_dimension_numbers<[1], [0], [0], [1], [0, 0, 1, 1], [], []>} : vector<16x72xbf16>, vector<72x32xbf16>, vector<16x32xf32> -> vector<16x32xf32>
    %c1_40 = arith.constant 1 : index
    %c0_41 = arith.constant 0 : index
    %c0_42 = arith.constant 0 : index
    %91 = vector.load %arg1[%c1_40, %c0_41, %c0_42] : memref<2x72x32xbf16, #tpu.memory_space<vmem>>, vector<1x72x32xbf16>
    %92 = vector.shape_cast %91 : vector<1x72x32xbf16> to vector<72x32xbf16>
    %cst_43 = arith.constant dense<0.000000e+00> : vector<16x32xf32>
    %93 = tpu.matmul %0, %92, %cst_43 {dimension_numbers = #tpu.dot_dimension_numbers<[1], [0], [0], [1], [0, 0, 1, 1], [], []>} : vector<16x72xbf16>, vector<72x32xbf16>, vector<16x32xf32> -> vector<16x32xf32>
    %c1_44 = arith.constant 1 : index
    %c0_45 = arith.constant 0 : index
    %c0_46 = arith.constant 0 : index
    %94 = vector.load %arg2[%c1_44, %c0_45, %c0_46] : memref<2x72x32xbf16, #tpu.memory_space<vmem>>, vector<1x72x32xbf16>
    %95 = vector.shape_cast %94 : vector<1x72x32xbf16> to vector<72x32xbf16>
    %cst_47 = arith.constant dense<0.000000e+00> : vector<16x32xf32>
    %96 = tpu.matmul %0, %95, %cst_47 {dimension_numbers = #tpu.dot_dimension_numbers<[1], [0], [0], [1], [0, 0, 1, 1], [], []>} : vector<16x72xbf16>, vector<72x32xbf16>, vector<16x32xf32> -> vector<16x32xf32>
    %c1_48 = arith.constant 1 : index
    %c0_49 = arith.constant 0 : index
    %c0_50 = arith.constant 0 : index
    %97 = vector.load %arg3[%c1_48, %c0_49, %c0_50] : memref<2x72x32xbf16, #tpu.memory_space<vmem>>, vector<1x72x32xbf16>
    %98 = vector.shape_cast %97 : vector<1x72x32xbf16> to vector<72x32xbf16>
    %cst_51 = arith.constant dense<0.000000e+00> : vector<16x32xf32>
    %99 = tpu.matmul %0, %98, %cst_51 {dimension_numbers = #tpu.dot_dimension_numbers<[1], [0], [0], [1], [0, 0, 1, 1], [], []>} : vector<16x72xbf16>, vector<72x32xbf16>, vector<16x32xf32> -> vector<16x32xf32>
    %cst_52 = arith.constant dense<0.000000e+00> : vector<16xf32>
    %100 = vector.multi_reduction <add>, %90, %cst_52 [1] : vector<16x32xf32> to vector<16xf32>
    %101 = vector.shape_cast %100 : vector<16xf32> to vector<16x1xf32>
    %cst_53 = arith.constant 0.000000e+00 : f32
    %102 = vector.broadcast %cst_53 : f32 to vector<16x1xf32>
    %103 = arith.addf %102, %101 : vector<16x1xf32>
    %cst_54 = arith.constant dense<0.000000e+00> : vector<16xf32>
    %104 = vector.multi_reduction <add>, %93, %cst_54 [1] : vector<16x32xf32> to vector<16xf32>
    %105 = vector.shape_cast %104 : vector<16xf32> to vector<16x1xf32>
    %106 = arith.addf %103, %105 : vector<16x1xf32>
    %cst_55 = arith.constant dense<0.000000e+00> : vector<16xf32>
    %107 = vector.multi_reduction <add>, %96, %cst_55 [1] : vector<16x32xf32> to vector<16xf32>
    %108 = vector.shape_cast %107 : vector<16xf32> to vector<16x1xf32>
    %109 = arith.addf %106, %108 : vector<16x1xf32>
    %cst_56 = arith.constant dense<0.000000e+00> : vector<16xf32>
    %110 = vector.multi_reduction <add>, %99, %cst_56 [1] : vector<16x32xf32> to vector<16xf32>
    %111 = vector.shape_cast %110 : vector<16xf32> to vector<16x1xf32>
    %112 = arith.addf %109, %111 : vector<16x1xf32>
    %cst_57 = arith.constant 7.812500e-03 : f32
    %113 = vector.broadcast %cst_57 : f32 to vector<16x1xf32>
    %114 = arith.mulf %112, %113 : vector<16x1xf32>
    %115 = vector.broadcast %114 : vector<16x1xf32> to vector<16x32xf32>
    %116 = arith.subf %90, %115 : vector<16x32xf32>
    %117 = arith.mulf %116, %116 : vector<16x32xf32>
    %cst_58 = arith.constant dense<0.000000e+00> : vector<16xf32>
    %118 = vector.multi_reduction <add>, %117, %cst_58 [1] : vector<16x32xf32> to vector<16xf32>
    %119 = vector.shape_cast %118 : vector<16xf32> to vector<16x1xf32>
    %cst_59 = arith.constant 0.000000e+00 : f32
    %120 = vector.broadcast %cst_59 : f32 to vector<16x1xf32>
    %121 = arith.addf %120, %119 : vector<16x1xf32>
    %122 = vector.broadcast %114 : vector<16x1xf32> to vector<16x32xf32>
    %123 = arith.subf %93, %122 : vector<16x32xf32>
    %124 = arith.mulf %123, %123 : vector<16x32xf32>
    %cst_60 = arith.constant dense<0.000000e+00> : vector<16xf32>
    %125 = vector.multi_reduction <add>, %124, %cst_60 [1] : vector<16x32xf32> to vector<16xf32>
    %126 = vector.shape_cast %125 : vector<16xf32> to vector<16x1xf32>
    %127 = arith.addf %121, %126 : vector<16x1xf32>
    %128 = vector.broadcast %114 : vector<16x1xf32> to vector<16x32xf32>
    %129 = arith.subf %96, %128 : vector<16x32xf32>
    %130 = arith.mulf %129, %129 : vector<16x32xf32>
    %cst_61 = arith.constant dense<0.000000e+00> : vector<16xf32>
    %131 = vector.multi_reduction <add>, %130, %cst_61 [1] : vector<16x32xf32> to vector<16xf32>
    %132 = vector.shape_cast %131 : vector<16xf32> to vector<16x1xf32>
    %133 = arith.addf %127, %132 : vector<16x1xf32>
    %134 = vector.broadcast %114 : vector<16x1xf32> to vector<16x32xf32>
    %135 = arith.subf %99, %134 : vector<16x32xf32>
    %136 = arith.mulf %135, %135 : vector<16x32xf32>
    %cst_62 = arith.constant dense<0.000000e+00> : vector<16xf32>
    %137 = vector.multi_reduction <add>, %136, %cst_62 [1] : vector<16x32xf32> to vector<16xf32>
    %138 = vector.shape_cast %137 : vector<16xf32> to vector<16x1xf32>
    %139 = arith.addf %133, %138 : vector<16x1xf32>
    %cst_63 = arith.constant 7.812500e-03 : f32
    %140 = vector.broadcast %cst_63 : f32 to vector<16x1xf32>
    %141 = arith.mulf %139, %140 : vector<16x1xf32>
    %cst_64 = arith.constant 9.99999974E-6 : f32
    %142 = vector.broadcast %cst_64 : f32 to vector<16x1xf32>
    %143 = arith.addf %141, %142 : vector<16x1xf32>
    %144 = math.rsqrt %143 : vector<16x1xf32>
    %145 = arith.mulf %1, %144 : vector<16x1xf32>
    %146 = arith.mulf %114, %145 : vector<16x1xf32>
    %147 = arith.subf %2, %146 : vector<16x1xf32>
    %148 = vector.broadcast %145 : vector<16x1xf32> to vector<16x32xf32>
    %149 = arith.mulf %90, %148 : vector<16x32xf32>
    %150 = vector.broadcast %147 : vector<16x1xf32> to vector<16x32xf32>
    %151 = arith.addf %149, %150 : vector<16x32xf32>
    %152 = vector.broadcast %145 : vector<16x1xf32> to vector<16x32xf32>
    %153 = arith.mulf %93, %152 : vector<16x32xf32>
    %154 = vector.broadcast %147 : vector<16x1xf32> to vector<16x32xf32>
    %155 = arith.addf %153, %154 : vector<16x32xf32>
    %156 = vector.broadcast %145 : vector<16x1xf32> to vector<16x32xf32>
    %157 = arith.mulf %96, %156 : vector<16x32xf32>
    %158 = vector.broadcast %147 : vector<16x1xf32> to vector<16x32xf32>
    %159 = arith.addf %157, %158 : vector<16x32xf32>
    %160 = vector.broadcast %145 : vector<16x1xf32> to vector<16x32xf32>
    %161 = arith.mulf %99, %160 : vector<16x32xf32>
    %162 = vector.broadcast %147 : vector<16x1xf32> to vector<16x32xf32>
    %163 = arith.addf %161, %162 : vector<16x32xf32>
    %164 = arith.maximumf %151, %155 : vector<16x32xf32>
    %165 = arith.maximumf %159, %163 : vector<16x32xf32>
    %166 = arith.maximumf %164, %165 : vector<16x32xf32>
    %cst_65 = arith.constant 0.000000e+00 : f32
    %167 = vector.broadcast %cst_65 : f32 to vector<16x32xf32>
    %168 = arith.maximumf %166, %167 : vector<16x32xf32>
    %169 = arith.truncf %168 : vector<16x32xf32> to vector<16x32xbf16>
    %c1_66 = arith.constant 1 : index
    %c0_67 = arith.constant 0 : index
    %c0_68 = arith.constant 0 : index
    %170 = vector.load %arg7[%c1_66, %c0_67, %c0_68] : memref<2x16x32xbf16, #tpu.memory_space<vmem>>, vector<1x16x32xbf16>
    %171 = vector.shape_cast %170 : vector<1x16x32xbf16> to vector<16x32xbf16>
    %172 = vector.shape_cast %169 : vector<16x32xbf16> to vector<1x16x32xbf16>
    tpu.vector_store %arg7[%c1_66, %c0_67, %c0_68], %172 {strides = array<i32>} : memref<2x16x32xbf16, #tpu.memory_space<vmem>>, vector<1x16x32xbf16>,
    return
  }
}

module attributes {stable_mosaic.version = 11 : i64} {
  func.func @fc_siamese_kernel(%arg0: memref<2x2x256xbf16, #tpu.memory_space<vmem>>, %arg1: memref<256x32xbf16, #tpu.memory_space<vmem>>, %arg2: memref<1x32xf32, #tpu.memory_space<vmem>>, %arg3: memref<32x1xbf16, #tpu.memory_space<vmem>>, %arg4: memref<1x1xf32, #tpu.memory_space<vmem>>, %arg5: memref<2x1xf32, #tpu.memory_space<vmem>>) attributes {dimension_semantics = [], scalar_prefetch = 0 : i64, scratch_operands = 0 : i64, tpu.core_type = #tpu.core_type<tc>} {
    %c0 = arith.constant 0 : index
    %c0_0 = arith.constant 0 : index
    %c0_1 = arith.constant 0 : index
    %0 = vector.load %arg0[%c0, %c0_0, %c0_1] : memref<2x2x256xbf16, #tpu.memory_space<vmem>>, vector<1x2x256xbf16>
    %1 = vector.shape_cast %0 : vector<1x2x256xbf16> to vector<2x256xbf16>
    %c0_2 = arith.constant 0 : index
    %c0_3 = arith.constant 0 : index
    %2 = vector.load %arg1[%c0_2, %c0_3] : memref<256x32xbf16, #tpu.memory_space<vmem>>, vector<256x32xbf16>
    %c0_4 = arith.constant 0 : index
    %c0_5 = arith.constant 0 : index
    %3 = vector.load %arg2[%c0_4, %c0_5] : memref<1x32xf32, #tpu.memory_space<vmem>>, vector<1x32xf32>
    %cst = arith.constant dense<0.000000e+00> : vector<2x32xf32>
    %4 = tpu.matmul %1, %2, %cst {dimension_numbers = #tpu.dot_dimension_numbers<[1], [0], [0], [1], [0, 0, 1, 1], [], []>} : vector<2x256xbf16>, vector<256x32xbf16>, vector<2x32xf32> -> vector<2x32xf32>
    %5 = vector.broadcast %3 : vector<1x32xf32> to vector<2x32xf32>
    %6 = arith.addf %4, %5 : vector<2x32xf32>
    %7 = arith.negf %6 : vector<2x32xf32>
    %8 = math.exp %7 : vector<2x32xf32>
    %cst_6 = arith.constant 1.000000e+00 : f32
    %9 = vector.broadcast %cst_6 : f32 to vector<2x32xf32>
    %10 = arith.addf %9, %8 : vector<2x32xf32>
    %11 = arith.divf %9, %10 : vector<2x32xf32>
    %12 = arith.truncf %11 : vector<2x32xf32> to vector<2x32xbf16>
    %13 = arith.extf %12 : vector<2x32xbf16> to vector<2x32xf32>
    %c1 = arith.constant 1 : index
    %c0_7 = arith.constant 0 : index
    %c0_8 = arith.constant 0 : index
    %14 = vector.load %arg0[%c1, %c0_7, %c0_8] : memref<2x2x256xbf16, #tpu.memory_space<vmem>>, vector<1x2x256xbf16>
    %15 = vector.shape_cast %14 : vector<1x2x256xbf16> to vector<2x256xbf16>
    %c0_9 = arith.constant 0 : index
    %c0_10 = arith.constant 0 : index
    %16 = vector.load %arg1[%c0_9, %c0_10] : memref<256x32xbf16, #tpu.memory_space<vmem>>, vector<256x32xbf16>
    %c0_11 = arith.constant 0 : index
    %c0_12 = arith.constant 0 : index
    %17 = vector.load %arg2[%c0_11, %c0_12] : memref<1x32xf32, #tpu.memory_space<vmem>>, vector<1x32xf32>
    %cst_13 = arith.constant dense<0.000000e+00> : vector<2x32xf32>
    %18 = tpu.matmul %15, %16, %cst_13 {dimension_numbers = #tpu.dot_dimension_numbers<[1], [0], [0], [1], [0, 0, 1, 1], [], []>} : vector<2x256xbf16>, vector<256x32xbf16>, vector<2x32xf32> -> vector<2x32xf32>
    %19 = vector.broadcast %17 : vector<1x32xf32> to vector<2x32xf32>
    %20 = arith.addf %18, %19 : vector<2x32xf32>
    %21 = arith.negf %20 : vector<2x32xf32>
    %22 = math.exp %21 : vector<2x32xf32>
    %cst_14 = arith.constant 1.000000e+00 : f32
    %23 = vector.broadcast %cst_14 : f32 to vector<2x32xf32>
    %24 = arith.addf %23, %22 : vector<2x32xf32>
    %25 = arith.divf %23, %24 : vector<2x32xf32>
    %26 = arith.truncf %25 : vector<2x32xf32> to vector<2x32xbf16>
    %27 = arith.extf %26 : vector<2x32xbf16> to vector<2x32xf32>
    %28 = arith.subf %13, %27 : vector<2x32xf32>
    %29 = math.absf %28 : vector<2x32xf32>
    %30 = arith.truncf %29 : vector<2x32xf32> to vector<2x32xbf16>
    %c0_15 = arith.constant 0 : index
    %c0_16 = arith.constant 0 : index
    %31 = vector.load %arg3[%c0_15, %c0_16] : memref<32x1xbf16, #tpu.memory_space<vmem>>, vector<32x1xbf16>
    %c0_17 = arith.constant 0 : index
    %c0_18 = arith.constant 0 : index
    %32 = vector.load %arg4[%c0_17, %c0_18] : memref<1x1xf32, #tpu.memory_space<vmem>>, vector<1x1xf32>
    %cst_19 = arith.constant dense<0.000000e+00> : vector<2x1xf32>
    %33 = tpu.matmul %30, %31, %cst_19 {dimension_numbers = #tpu.dot_dimension_numbers<[1], [0], [0], [1], [0, 0, 1, 1], [], []>} : vector<2x32xbf16>, vector<32x1xbf16>, vector<2x1xf32> -> vector<2x1xf32>
    %34 = vector.broadcast %32 : vector<1x1xf32> to vector<2x1xf32>
    %35 = arith.addf %33, %34 : vector<2x1xf32>
    %36 = arith.negf %35 : vector<2x1xf32>
    %37 = math.exp %36 : vector<2x1xf32>
    %cst_20 = arith.constant 1.000000e+00 : f32
    %38 = vector.broadcast %cst_20 : f32 to vector<2x1xf32>
    %39 = arith.addf %38, %37 : vector<2x1xf32>
    %40 = arith.divf %38, %39 : vector<2x1xf32>
    %c0_21 = arith.constant 0 : index
    %c0_22 = arith.constant 0 : index
    %41 = vector.load %arg5[%c0_21, %c0_22] : memref<2x1xf32, #tpu.memory_space<vmem>>, vector<2x1xf32>
    tpu.vector_store %arg5[%c0_21, %c0_22], %40 {strides = array<i32>} : memref<2x1xf32, #tpu.memory_space<vmem>>, vector<2x1xf32>,
    return
  }
}

</mosaic_0001>

<bundles_post_ra>
// kernel: siamese_forward.3
= control target key start
LH: loop header
LB: loop body
LE: loop exit
PB: predicated region body
PF: predicated region fallthrough
CT: control target
= control target key end

     0   :  { %vm41_vm0 = vcmask 1043456   ;;  %vm42_vm1 = vcmask 1044480   ;;  %v441_v2 = vmov 65535   ;;  %vm37_vm2 = vcmask 72704   ;;  %s608_s0 = inlined_call_operand.vmem [shape: bf16[2,9,128], index: 0, kind: input, shape index: {}]   ;;  %s609_s1 = inlined_call_operand.vmem [shape: bf16[2,9,128], index: 1, kind: input, shape index: {}]   ;;  %s610_s2 = inlined_call_operand.vmem [shape: bf16[2,9,128], index: 2, kind: input, shape index: {}]   ;;  %s611_s3 = inlined_call_operand.vmem [shape: bf16[2,9,128], index: 3, kind: input, shape index: {}]   ;;  %s612_s4 = inlined_call_operand.vmem [shape: bf16[8,9], index: 4, kind: input, shape index: {}]   ;;  %s613_s5 = inlined_call_operand.vmem [shape: f32[8,1], index: 5, kind: input, shape index: {}]   ;;  %s614_s6 = inlined_call_operand.vmem [shape: f32[8,1], index: 6, kind: input, shape index: {}]   ;;  %s615_s7 = inlined_call_operand.vmem [shape: bf16[2,8,128], index: 7, kind: output, shape index: {}]  }
   0x1   :  { %v377_v0 = vld [vmem:[%s608_s0] sm:$0xf]  ;;  %v424_v1 = vld [vmem:[%s608_s0] sm:$0x10]  ;;  %v43_v3 = vsel %vm41_vm0, 4294967295, %v441_v2 }
   0x2   :  { %v378_v4 = vor.u32 %v424_v1, %v377_v0  ;;  %v44_v5 = vsel %vm42_vm1, %v43_v3, 0  ;;  %v382_v6 = vld [vmem:[%s609_s1] sm:$0xf]  ;;  %v425_v7 = vld [vmem:[%s609_s1] sm:$0x10] }
   0x3   :  { %v383_v8 = vor.u32 %v425_v7, %v382_v6  ;;  %v387_v9 = vld [vmem:[%s610_s2] sm:$0xf]  ;;  %v426_v10 = vld [vmem:[%s610_s2] sm:$0x10]  ;;  %v399_v16 = vld [vmem:[%s608_s0 + $0x8] sm:$0xf] }
   0x4   :  { %v392_v11 = vld [vmem:[%s611_s3] sm:$0xf]  ;;  %v46_v12 = vand.u32 %v378_v4, %v44_v5  ;;  %v388_v13 = vor.u32 %v426_v10, %v387_v9  ;;  %v427_v14 = vld [vmem:[%s611_s3] sm:$0x10]  ;;  %v428_v19 = vld [vmem:[%s608_s0 + $0x8] sm:$0x10] }
   0x5   :  { %v27_v15 = vld [vmem:[%s612_s4] sm:$0xf]  ;;  %v69_v17 = vand.u32 %v383_v8, %v44_v5  ;;  %v393_v18 = vor.u32 %v427_v14, %v392_v11  ;;  %v406_v20 = vld [vmem:[%s609_s1 + $0x8] sm:$0xf]  ;;  %v429_v21 = vld [vmem:[%s609_s1 + $0x8] sm:$0x10]  ;;  %v400_v23 = vor.u32 %v428_v19, %v399_v16 }
   0x6   :  { %55 = vmatpush.bf16.msra.mxu0 %v46_v12  ;;  %v92_v22 = vand.u32 %v388_v13, %v44_v5  ;;  %v407_v24 = vor.u32 %v429_v21, %v406_v20  ;;  %v413_v25 = vld [vmem:[%s610_s2 + $0x8] sm:$0xf]  ;;  %v430_v26 = vld [vmem:[%s610_s2 + $0x8] sm:$0x10] }
   0x7   :  { %v420_v27 = vld [vmem:[%s611_s3 + $0x8] sm:$0xf]  ;;  %78 = vmatpush.bf16.msra.mxu1 %v69_v17  ;;  %v115_v28 = vand.u32 %v393_v18, %v44_v5  ;;  %v414_v29 = vor.u32 %v430_v26, %v413_v25  ;;  %v431_v30 = vld [vmem:[%s611_s3 + $0x8] sm:$0x10]  ;;  %v211_v31 = vand.u32 %v400_v23, %v44_v5  ;;  %v442_v23 = vmov 0  }
   0x8   :  { %101 = vmatpush.bf16.msra.mxu2 %v92_v22  ;;  %v235_v32 = vand.u32 %v407_v24, %v44_v5  ;;  %v421_v33 = vor.u32 %v431_v30, %v420_v27  ;;  %434 = vset.pattern.permute.xlu1 %v442_v23 }
   0x9   :  { %124 = vmatpush.bf16.msra.mxu3 %v115_v28  ;;  %379 = vmatmul.msk.bf16.vlgmr.msra.gmra.mxu0 %vm37_vm2, %v27_v15  ;;  %v259_v34 = vand.u32 %v414_v29, %v44_v5 }
   0xa   :  { %384 = vmatmul.msk.bf16.vlgmr.msra.gmra.mxu1 %vm37_vm2, %v27_v15  ;;  %220 = vmatpush.bf16.msrb.mxu0 %v211_v31  ;;  %v283_v35 = vand.u32 %v421_v33, %v44_v5 }
   0xb   :  { %389 = vmatmul.msk.bf16.vlgmr.msra.gmra.mxu2 %vm37_vm2, %v27_v15  ;;  %244 = vmatpush.bf16.msrb.mxu1 %v235_v32 }
   0xc   :  { %394 = vmatmul.msk.bf16.vlgmr.msra.gmra.mxu3 %vm37_vm2, %v27_v15  ;;  %268 = vmatpush.bf16.msrb.mxu2 %v259_v34 }
   0xd   :  { %292 = vmatpush.bf16.msrb.mxu3 %v283_v35  ;;  %435 = vset.pattern.permute.xlu2 %v442_v23 }
   0xe   :  { %436 = vset.pattern.permute.xlu0 %v442_v23 }
  0x19   :  { %401 = vmatmul.msk.bf16.vlgmr.msrb.gmra.mxu0 %vm37_vm2, %v27_v15 }
  0x1a   :  { %408 = vmatmul.msk.bf16.vlgmr.msrb.gmra.mxu1 %vm37_vm2, %v27_v15 }
  0x1b   :  { %415 = vmatmul.msk.bf16.vlgmr.msrb.gmra.mxu2 %vm37_vm2, %v27_v15 }
  0x1c   :  { %422 = vmatmul.msk.bf16.vlgmr.msrb.gmra.mxu3 %vm37_vm2, %v27_v15 }
  0x86   :  { %v542_v36 = vpop.f32.mrf.mxu0 }
  0x87   :  { %v544_v37 = vpop.f32.mrf.mxu1  ;;  %130 = vadd.xlane.f32.xlu0 %v542_v36 }
  0x8e   :  { %v547_v38 = vpop.f32.mrf.mxu2  ;;  %v59_v39 = vpop.f32.mrf.mxu0 }
  0x8f   :  { %v82_v40 = vpop.f32.mrf.mxu1  ;;  %v549_v41 = vpop.f32.mrf.mxu3  ;;  %133 = vadd.xlane.f32.xlu0 %v544_v37  ;;  %136 = vadd.xlane.f32.xlu2 %v547_v38 }
  0x96   :  { %v105_v42 = vpop.f32.mrf.mxu2  ;;  %v553_v43 = vpop.f32.mrf.mxu0 }
  0x97   :  { %v128_v44 = vpop.f32.mrf.mxu3  ;;  %v555_v45 = vpop.f32.mrf.mxu1  ;;  %139 = vadd.xlane.f32.xlu0 %v549_v41  ;;  %298 = vadd.xlane.f32.xlu1 %v553_v43 }
  0x9e   :  { %v559_v46 = vpop.f32.mrf.mxu2  ;;  %v224_v47 = vpop.f32.mrf.mxu0 }
  0x9f   :  { %v248_v48 = vpop.f32.mrf.mxu1  ;;  %v561_v49 = vpop.f32.mrf.mxu3  ;;  %301 = vadd.xlane.f32.xlu1 %v555_v45  ;;  %304 = vadd.xlane.f32.xlu2 %v559_v46 }
  0xa6   :  { %v272_v50 = vpop.f32.mrf.mxu2 }
  0xa7   :  { %v296_v51 = vpop.f32.mrf.mxu3  ;;  %307 = vadd.xlane.f32.xlu1 %v561_v49 }
  0xfa   :  { %v131_v52 = vpop.xlane.xlu0 %130 }
 0x102   :  { %v134_v53 = vpop.xlane.xlu0 %133  ;;  %v137_v55 = vpop.xlane.xlu2 %136 }
 0x103   :  { %v135_v54 = vadd.f32 %v134_v53, %v131_v52 }
 0x105   :  { %v138_v56 = vadd.f32 %v137_v55, %v135_v54 }
 0x10a   :  { %v140_v57 = vpop.xlane.xlu0 %139  ;;  %v299_v58 = vpop.xlane.xlu1 %298 }
 0x10b   :  { %v141_v59 = vadd.f32 %v140_v57, %v138_v56  ;;  %v28_v56 = vld [vmem:[%s613_s5] sm:$0xff] }
 0x10d   :  { %v566_v60 = vmul.f32 0.001953125, %v141_v59 }
 0x10f   :  { %v148_v61 = vsub.f32 %v544_v37, %v566_v60  ;;  %v143_v62 = vsub.f32 %v542_v36, %v566_v60  ;;  %v153_v3 = vsub.f32 %v547_v38, %v566_v60  ;;  %v158_v16 = vsub.f32 %v549_v41, %v566_v60 }
 0x111   :  { %v149_v63 = vmul.f32 %v148_v61, %v148_v61  ;;  %v144_v0 = vmul.f32 %v143_v62, %v143_v62  ;;  %v154_v6 = vmul.f32 %v153_v3, %v153_v3  ;;  %v159_v18 = vmul.f32 %v158_v16, %v158_v16 }
 0x112   :  { %v302_v1 = vpop.xlane.xlu1 %301  ;;  %v305_v4 = vpop.xlane.xlu2 %304 }
 0x113   :  { %150 = vadd.xlane.f32.xlu0 %v149_v63  ;;  %145 = vadd.xlane.f32.xlu2 %v144_v0  ;;  %v303_v2 = vadd.f32 %v302_v1, %v299_v58  ;;  %v29_v63 = vld [vmem:[%s614_s6] sm:$0xff] }
 0x115   :  { %v306_v5 = vadd.f32 %v305_v4, %v303_v2 }
 0x11a   :  { %v308_v7 = vpop.xlane.xlu1 %307 }
 0x11b   :  { %v309_v8 = vadd.f32 %v308_v7, %v306_v5  ;;  %155 = vadd.xlane.f32.xlu0 %v154_v6 }
 0x11d   :  { %v574_v9 = vmul.f32 0.001953125, %v309_v8 }
 0x11f   :  { %v326_v10 = vsub.f32 %v561_v49, %v574_v9  ;;  %v316_v11 = vsub.f32 %v555_v45, %v574_v9  ;;  %v311_v12 = vsub.f32 %v553_v43, %v574_v9  ;;  %v321_v17 = vsub.f32 %v559_v46, %v574_v9 }
 0x121   :  { %v327_v13 = vmul.f32 %v326_v10, %v326_v10  ;;  %v317_v14 = vmul.f32 %v316_v11, %v316_v11  ;;  %v312_v15 = vmul.f32 %v311_v12, %v311_v12  ;;  %v322_v19 = vmul.f32 %v321_v17, %v321_v17 }
 0x123   :  { %328 = vadd.xlane.f32.xlu0 %v327_v13  ;;  %318 = vadd.xlane.f32.xlu2 %v317_v14 }
 0x124   :  { %313 = vadd.xlane.f32.xlu1 %v312_v15 }
 0x12b   :  { %160 = vadd.xlane.f32.xlu2 %v159_v18 }
 0x12c   :  { %323 = vadd.xlane.f32.xlu1 %v322_v19 }
 0x186   :  { %v151_v20 = vpop.xlane.xlu0 %150  ;;  %v146_v21 = vpop.xlane.xlu2 %145 }
 0x187   :  { %v152_v26 = vadd.f32 %v151_v20, %v146_v21 }
 0x18e   :  { %v156_v24 = vpop.xlane.xlu0 %155 }
 0x18f   :  { %v157_v27 = vadd.f32 %v156_v24, %v152_v26 }
 0x196   :  { %v319_v22 = vpop.xlane.xlu2 %318  ;;  %v329_v33 = vpop.xlane.xlu0 %328 }
 0x197   :  { %v314_v25 = vpop.xlane.xlu1 %313 }
 0x198   :  { %v320_v28 = vadd.f32 %v319_v22, %v314_v25 }
 0x19e   :  { %v161_v29 = vpop.xlane.xlu2 %160 }
 0x19f   :  { %v162_v30 = vadd.f32 %v161_v29, %v157_v27  ;;  %v324_v31 = vpop.xlane.xlu1 %323 }
 0x1a0   :  { %v325_v32 = vadd.f32 %v324_v31, %v320_v28 }
 0x1a1   :  { %v163_v34 = vmul.f32 0.001953125, %v162_v30 }
 0x1a2   :  { %v330_v35 = vadd.f32 %v329_v33, %v325_v32 }
 0x1a3   :  { %v164_v39 = vadd.f32 1e-05, %v163_v34 }
 0x1a4   :  { %v331_v40 = vmul.f32 0.001953125, %v330_v35 }
 0x1a5   :  { %437 = vrsqrt.f32 %v164_v39  ;;  %vm171_vm4 = vweird.f32 %v164_v39 }
 0x1a6   :  { %v332_v42 = vadd.f32 1e-05, %v331_v40 }
 0x1a8   :  { %439 = vrsqrt.f32 %v332_v42  ;;  %vm339_vm7 = vweird.f32 %v332_v42 }
 0x1ab   :  { %v438_v44 = vpop.eup %437 }
 0x1ac   :  { %v166_v47 = vmul.f32 %v438_v44, %v164_v39  ;;  %vm172_vm3 = vweird.f32 %v438_v44 }
 0x1ad   :  { %vm173_vm5 = vmor %vm171_vm4, %vm172_vm3 }
 0x1ae   :  { %v440_v48 = vpop.eup %439  ;;  %v167_v50 = vmul.f32 %v438_v44, %v166_v47 }
 0x1af   :  { %v334_v51 = vmul.f32 %v440_v48, %v332_v42  ;;  %vm340_vm6 = vweird.f32 %v440_v48 }
 0x1b0   :  { %v168_v52 = vmul.f32 0.5, %v167_v50  ;;  %vm341_vm8 = vmor %vm339_vm7, %vm340_vm6 }
 0x1b1   :  { %v335_v53 = vmul.f32 %v440_v48, %v334_v51 }
 0x1b2   :  { %v169_v54 = vsub.f32 1.5, %v168_v52 }
 0x1b3   :  { %v336_v55 = vmul.f32 0.5, %v335_v53 }
 0x1b4   :  { %v170_v57 = vmul.f32 %v438_v44, %v169_v54 }
 0x1b5   :  { %v337_v58 = vsub.f32 1.5, %v336_v55 }
 0x1b6   :  { %v174_v59 = vsel %vm173_vm5, %v438_v44, %v170_v57 }
 0x1b7   :  { %v175_v61 = vmul.f32 %v174_v59, %v28_v56  ;;  %v338_v62 = vmul.f32 %v440_v48, %v337_v58 }
 0x1b9   :  { %180 = vperm.xlu1 %434, %v175_v61   ;;  %v342_v0 = vsel %vm341_vm8, %v440_v48, %v338_v62  ;;  %v176_v1 = vmul.f32 %v175_v61, %v566_v60 }
 0x1ba   :  { %v343_v2 = vmul.f32 %v342_v0, %v28_v56 }
 0x1bb   :  { %v177_v3 = vsub.f32 %v29_v63, %v176_v1 }
 0x1bc   :  { %348 = vperm.xlu2 %435, %v343_v2   ;;  %v344_v4 = vmul.f32 %v343_v2, %v574_v9 }
 0x1bd   :  { %186 = vperm.xlu0 %436, %v177_v3  }
 0x1be   :  { %v345_v5 = vsub.f32 %v29_v63, %v344_v4 }
 0x1c4   :  { %354 = vperm.xlu2 %435, %v345_v5  }
 0x216   :  { %v349_v6 = vpop.permute.xlu2 %348 }
 0x217   :  { %v351_v7 = vmul.f32 %v349_v6, %v553_v43  ;;  %v358_v8 = vmul.f32 %v349_v6, %v555_v45  ;;  %v360_v10 = vmul.f32 %v349_v6, %v559_v46  ;;  %v362_v11 = vmul.f32 %v349_v6, %v561_v49 }
 0x21e   :  { %v355_v12 = vpop.permute.xlu2 %354 }
 0x21f   :  { %v357_v13 = vadd.f32 %v355_v12, %v351_v7  ;;  %v359_v60 = vadd.f32 %v358_v8, %v355_v12  ;;  %v361_v14 = vadd.f32 %v360_v10, %v355_v12  ;;  %v363_v15 = vadd.f32 %v362_v11, %v355_v12 }
 0x221   :  { %v364_v16 = vmax.f32 %v357_v13, %v359_v60  ;;  %v365_v17 = vmax.f32 %v361_v14, %v363_v15 }
 0x223   :  { %v366_v18 = vmax.f32 %v364_v16, %v365_v17 }
 0x225   :  { %v367_v9 = vmax.f32 %v366_v18, 0.0 }
 0x227   :  { %v368_v19 = vpack.c.bf16 %v367_v9, %v367_v9 }
 0x229   :  { %423 = vst [vmem:[%s615_s7 + $0x4] sm:$0xf] %v368_v19 }
 0x22b   :  { %v181_v43 = vpop.permute.xlu1 %180 }
 0x22c   :  { %v183_v45 = vmul.f32 %v181_v43, %v542_v36  ;;  %v190_v46 = vmul.f32 %v181_v43, %v544_v37  ;;  %v192_v49 = vmul.f32 %v181_v43, %v547_v38  ;;  %v194_v20 = vmul.f32 %v181_v43, %v549_v41 }
 0x22f   :  { %v187_v21 = vpop.permute.xlu0 %186 }
 0x230   :  { %v189_v22 = vadd.f32 %v187_v21, %v183_v45  ;;  %v191_v23 = vadd.f32 %v190_v46, %v187_v21  ;;  %v193_v24 = vadd.f32 %v192_v49, %v187_v21  ;;  %v195_v25 = vadd.f32 %v194_v20, %v187_v21 }
 0x232   :  { %v196_v26 = vmax.f32 %v189_v22, %v191_v23  ;;  %v197_v27 = vmax.f32 %v193_v24, %v195_v25 }
 0x234   :  { %v198_v28 = vmax.f32 %v196_v26, %v197_v27 }
 0x236   :  { %v199_v29 = vmax.f32 %v198_v28, 0.0 }
 0x238   :  { %v200_v30 = vpack.c.bf16 %v199_v29, %v199_v29 }
 0x23a   :  { %201 = vst [vmem:[%s615_s7] sm:$0xf] %v200_v30 }

// kernel: siamese_forward.4
= control target key start
LH: loop header
LB: loop body
LE: loop exit
PB: predicated region body
PF: predicated region fallthrough
CT: control target
= control target key end

     0   :  { %vm78_vm0 = vcmask 1043456   ;;  %vm74_vm1 = vcmask 588800   ;;  %vm255_vm2 = vcmask 261120   ;;  %vm414_vm15 = vcmask 257024   ;;  %s1373_s0 = inlined_call_operand.vmem [shape: bf16[2,72,32], index: 0, kind: input, shape index: {}]   ;;  %s1374_s1 = inlined_call_operand.vmem [shape: bf16[2,72,32], index: 1, kind: input, shape index: {}]   ;;  %s1375_s2 = inlined_call_operand.vmem [shape: bf16[2,72,32], index: 2, kind: input, shape index: {}]   ;;  %s1376_s3 = inlined_call_operand.vmem [shape: bf16[2,72,32], index: 3, kind: input, shape index: {}]   ;;  %s1377_s4 = inlined_call_operand.vmem [shape: bf16[16,72], index: 4, kind: input, shape index: {}]   ;;  %s1378_s5 = inlined_call_operand.vmem [shape: f32[16,1], index: 5, kind: input, shape index: {}]   ;;  %s1379_s6 = inlined_call_operand.vmem [shape: f32[16,1], index: 6, kind: input, shape index: {}]   ;;  %s1380_s7 = inlined_call_operand.vmem [shape: bf16[2,16,32], index: 7, kind: output, shape index: {}]  }
   0x1   :  { %v41_v0 = vld [vmem:[%s1373_s0 + $0x20] sm:$0xf]  ;;  %v980_v16 = vld [vmem:[%s1373_s0 + $0x18] sm:$0xff]  ;;  %v979_v20 = vld [vmem:[%s1373_s0 + $0x10] sm:$0xff] }
   0x2   :  { %v104_v1 = vld [vmem:[%s1374_s1 + $0x20] sm:$0xf]  ;;  %v64_v3 = vunpack.c.l.b16 %v41_v0  ;;  %v984_v17 = vld [vmem:[%s1374_s1 + $0x18] sm:$0xff]  ;;  %v878_v21 = vld [vmem:[%s1373_s0 + $0x44] sm:$0xf] }
   0x3   :  { %v157_v2 = vld [vmem:[%s1375_s2 + $0x20] sm:$0xf]  ;;  %v122_v4 = vunpack.c.l.b16 %v104_v1  ;;  %v988_v18 = vld [vmem:[%s1375_s2 + $0x18] sm:$0xff]  ;;  %v983_v22 = vld [vmem:[%s1374_s1 + $0x10] sm:$0xff]  ;;  %v444_v27 = vunpack.c.l.b16 %v878_v21 }
   0x4   :  { %v175_v5 = vunpack.c.l.b16 %v157_v2  ;;  %v210_v6 = vld [vmem:[%s1376_s3 + $0x20] sm:$0xf]  ;;  %v69_v8 = vpack.c.b16 %v64_v3, %v64_v3  ;;  %v992_v19 = vld [vmem:[%s1376_s3 + $0x18] sm:$0xff]  ;;  %v904_v23 = vld [vmem:[%s1374_s1 + $0x44] sm:$0xf] }
   0x5   :  { %v228_v7 = vunpack.c.l.b16 %v210_v6  ;;  %v127_v9 = vpack.c.b16 %v122_v4, %v122_v4  ;;  %v930_v24 = vld [vmem:[%s1375_s2 + $0x44] sm:$0xf]  ;;  %v987_v25 = vld [vmem:[%s1375_s2 + $0x10] sm:$0xff]  ;;  %v498_v28 = vunpack.c.l.b16 %v904_v23  ;;  %v978_v31 = vld [vmem:[%s1373_s0 + $0x8] sm:$0xff]  ;;  %v449_v35 = vpack.c.b16 %v444_v27, %v444_v27 }
   0x6   :  { %v180_v10 = vpack.c.b16 %v175_v5, %v175_v5  ;;  %v80_v12 = vsel %vm78_vm0, %v69_v8, 0  ;;  %v991_v26 = vld [vmem:[%s1376_s3 + $0x10] sm:$0xff]  ;;  %v552_v29 = vunpack.c.l.b16 %v930_v24  ;;  %v956_v30 = vld [vmem:[%s1376_s3 + $0x44] sm:$0xf]  ;;  %v982_v32 = vld [vmem:[%s1374_s1 + $0x8] sm:$0xff] }
   0x7   :  { %v233_v11 = vpack.c.b16 %v228_v7, %v228_v7  ;;  %v133_v13 = vsel %vm78_vm0, %v127_v9, 0  ;;  %85 = vmatpush.bf16.msra.mxu0 %v80_v12  ;;  %v986_v33 = vld [vmem:[%s1375_s2 + $0x8] sm:$0xff]  ;;  %v606_v36 = vunpack.c.l.b16 %v956_v30  ;;  %v503_v37 = vpack.c.b16 %v498_v28, %v498_v28  ;;  %v977_v39 = vld [vmem:[%s1373_s0] sm:$0xff]  ;;  %v995_v52 = vld [vmem:[%s1373_s0 + $0x34] sm:$0xff] }
   0x8   :  { %v186_v14 = vsel %vm78_vm0, %v180_v10, 0  ;;  %138 = vmatpush.bf16.msra.mxu1 %v133_v13  ;;  %v990_v34 = vld [vmem:[%s1376_s3 + $0x8] sm:$0xff]  ;;  %v557_v38 = vpack.c.b16 %v552_v29, %v552_v29  ;;  %v981_v40 = vld [vmem:[%s1374_s1] sm:$0xff]  ;;  %v455_v42 = vsel %vm78_vm0, %v449_v35, 0  ;;  %v999_v54 = vld [vmem:[%s1374_s1 + $0x34] sm:$0xff] }
   0x9   :  { %v239_v15 = vsel %vm78_vm0, %v233_v11, 0  ;;  %191 = vmatpush.bf16.msra.mxu2 %v186_v14  ;;  %v985_v41 = vld [vmem:[%s1375_s2] sm:$0xff]  ;;  %v611_v43 = vpack.c.b16 %v606_v36, %v606_v36  ;;  %v509_v44 = vsel %vm78_vm0, %v503_v37, 0  ;;  %v1003_v55 = vld [vmem:[%s1375_s2 + $0x34] sm:$0xff]  ;;  %v994_v56 = vld [vmem:[%s1373_s0 + $0x2c] sm:$0xff] }
   0xa   :  { %244 = vmatpush.bf16.msra.mxu3 %v239_v15  ;;  %v563_v45 = vsel %vm78_vm0, %v557_v38, 0  ;;  %v989_v46 = vld [vmem:[%s1376_s3] sm:$0xff]  ;;  %v1007_v57 = vld [vmem:[%s1376_s3 + $0x34] sm:$0xff]  ;;  %v998_v58 = vld [vmem:[%s1374_s1 + $0x2c] sm:$0xff] }
   0xb   :  { %86 = vmatpush.bf16.msra.mxu0 %v980_v16  ;;  %v976_v47 = vld [vmem:[%s1377_s4] sm:$0xff]  ;;  %v617_v50 = vsel %vm78_vm0, %v611_v43, 0  ;;  %v1002_v59 = vld [vmem:[%s1375_s2 + $0x2c] sm:$0xff] }
   0xc   :  { %139 = vmatpush.bf16.msra.mxu1 %v984_v17  ;;  %v996_v48 = vld [vmem:[%s1373_s0 + $0x3c] sm:$0xff]  ;;  %v993_v60 = vld [vmem:[%s1373_s0 + $0x24] sm:$0xff]  ;;  %v1006_v61 = vld [vmem:[%s1376_s3 + $0x2c] sm:$0xff] }
   0xd   :  { %192 = vmatpush.bf16.msra.mxu2 %v988_v18  ;;  %v1000_v49 = vld [vmem:[%s1374_s1 + $0x3c] sm:$0xff]  ;;  %v997_v62 = vld [vmem:[%s1374_s1 + $0x24] sm:$0xff] }
   0xe   :  { %245 = vmatpush.bf16.msra.mxu3 %v992_v19  ;;  %v1004_v51 = vld [vmem:[%s1375_s2 + $0x3c] sm:$0xff]  ;;  %v1001_v63 = vld [vmem:[%s1375_s2 + $0x24] sm:$0xff] }
   0xf   :  { %87 = vmatpush.bf16.msra.mxu0 %v979_v20  ;;  %v1008_v53 = vld [vmem:[%s1376_s3 + $0x3c] sm:$0xff]  ;;  %v1005_v0 = vld [vmem:[%s1376_s3 + $0x24] sm:$0xff] }
  0x10   :  { %140 = vmatpush.bf16.msra.mxu1 %v983_v22 }
  0x11   :  { %193 = vmatpush.bf16.msra.mxu2 %v987_v25 }
  0x12   :  { %246 = vmatpush.bf16.msra.mxu3 %v991_v26 }
  0x13   :  { %88 = vmatpush.bf16.msra.mxu0 %v978_v31 }
  0x14   :  { %141 = vmatpush.bf16.msra.mxu1 %v982_v32 }
  0x15   :  { %194 = vmatpush.bf16.msra.mxu2 %v986_v33 }
  0x16   :  { %247 = vmatpush.bf16.msra.mxu3 %v990_v34 }
  0x17   :  { %89 = vmatpush.bf16.msra.mxu0 %v977_v39 }
  0x18   :  { %142 = vmatpush.bf16.msra.mxu1 %v981_v40 }
  0x19   :  { %195 = vmatpush.bf16.msra.mxu2 %v985_v41 }
  0x1a   :  { %248 = vmatpush.bf16.msra.mxu3 %v989_v46  ;;  %818 = vmatmul.msk.bf16.vlgmr.msra.gmra.mxu0 %vm74_vm1, %v976_v47 }
  0x1b   :  { %460 = vmatpush.bf16.msrb.mxu0 %v455_v42  ;;  %835 = vmatmul.msk.bf16.vlgmr.msra.gmra.mxu1 %vm74_vm1, %v976_v47 }
  0x1c   :  { %514 = vmatpush.bf16.msrb.mxu1 %v509_v44  ;;  %852 = vmatmul.msk.bf16.vlgmr.msra.gmra.mxu2 %vm74_vm1, %v976_v47 }
  0x1d   :  { %568 = vmatpush.bf16.msrb.mxu2 %v563_v45  ;;  %869 = vmatmul.msk.bf16.vlgmr.msra.gmra.mxu3 %vm74_vm1, %v976_v47 }
  0x1e   :  { %622 = vmatpush.bf16.msrb.mxu3 %v617_v50 }
  0x1f   :  { %461 = vmatpush.bf16.msrb.mxu0 %v996_v48 }
  0x20   :  { %515 = vmatpush.bf16.msrb.mxu1 %v1000_v49 }
  0x21   :  { %569 = vmatpush.bf16.msrb.mxu2 %v1004_v51 }
  0x22   :  { %623 = vmatpush.bf16.msrb.mxu3 %v1008_v53 }
  0x23   :  { %462 = vmatpush.bf16.msrb.mxu0 %v995_v52 }
  0x24   :  { %516 = vmatpush.bf16.msrb.mxu1 %v999_v54 }
  0x25   :  { %570 = vmatpush.bf16.msrb.mxu2 %v1003_v55 }
  0x26   :  { %624 = vmatpush.bf16.msrb.mxu3 %v1007_v57 }
  0x27   :  { %463 = vmatpush.bf16.msrb.mxu0 %v994_v56 }
  0x28   :  { %517 = vmatpush.bf16.msrb.mxu1 %v998_v58 }
  0x29   :  { %571 = vmatpush.bf16.msrb.mxu2 %v1002_v59 }
  0x2a   :  { %625 = vmatpush.bf16.msrb.mxu3 %v1006_v61 }
  0x2b   :  { %464 = vmatpush.bf16.msrb.mxu0 %v993_v60 }
  0x2c   :  { %518 = vmatpush.bf16.msrb.mxu1 %v997_v62 }
  0x2d   :  { %572 = vmatpush.bf16.msrb.mxu2 %v1001_v63 }
  0x2e   :  { %895 = vmatmul.msk.bf16.vlgmr.msrb.gmra.mxu0 %vm74_vm1, %v976_v47  ;;  %626 = vmatpush.bf16.msrb.mxu3 %v1005_v0 }
  0x2f   :  { %921 = vmatmul.msk.bf16.vlgmr.msrb.gmra.mxu1 %vm74_vm1, %v976_v47 }
  0x30   :  { %947 = vmatmul.msk.bf16.vlgmr.msrb.gmra.mxu2 %vm74_vm1, %v976_v47 }
  0x31   :  { %973 = vmatmul.msk.bf16.vlgmr.msrb.gmra.mxu3 %vm74_vm1, %v976_v47 }
  0x97   :  { %v1201_v1 = vpop.f32.mrf.mxu0 }
  0x98   :  { %v1203_v2 = vpop.f32.mrf.mxu1  ;;  %v256_v3 = vsel %vm255_vm2, %v1201_v1, 0.0 }
  0x99   :  { %v264_v4 = vsel %vm255_vm2, %v1203_v2, 0.0  ;;  %257 = vadd.xlane.f32.xlu0 %v256_v3 }
  0x9a   :  { %265 = vadd.xlane.f32.xlu1 %v264_v4 }
  0x9f   :  { %v1209_v5 = vpop.f32.mrf.mxu2  ;;  %v1213_v7 = vpop.f32.mrf.mxu0 }
  0xa0   :  { %v272_v6 = vsel %vm255_vm2, %v1209_v5, 0.0  ;;  %v1215_v8 = vpop.f32.mrf.mxu3  ;;  %v1217_v9 = vpop.f32.mrf.mxu1  ;;  %v259_v14 = vsel %vm255_vm2, %v1213_v7, 0.0 }
  0xa1   :  { %273 = vadd.xlane.f32.xlu2 %v272_v6  ;;  %v267_v10 = vsel %vm255_vm2, %v1217_v9, 0.0  ;;  %v280_v11 = vsel %vm255_vm2, %v1215_v8, 0.0 }
  0xa2   :  { %268 = vadd.xlane.f32.xlu1 %v267_v10  ;;  %281 = vadd.xlane.f32.xlu0 %v280_v11 }
  0xa7   :  { %v1223_v12 = vpop.f32.mrf.mxu2 }
  0xa8   :  { %v1231_v16 = vpop.f32.mrf.mxu3  ;;  %v275_v21 = vsel %vm255_vm2, %v1223_v12, 0.0 }
  0xa9   :  { %v283_v32 = vsel %vm255_vm2, %v1231_v16, 0.0 }
  0xaa   :  { %260 = vadd.xlane.f32.xlu0 %v259_v14 }
  0xab   :  { %v1225_v13 = vpop.f32.mrf.mxu0 }
  0xac   :  { %v633_v15 = vsel %vm255_vm2, %v1225_v13, 0.0  ;;  %v1233_v17 = vpop.f32.mrf.mxu1 }
  0xad   :  { %634 = vadd.xlane.f32.xlu2 %v633_v15  ;;  %v641_v27 = vsel %vm255_vm2, %v1233_v17, 0.0 }
  0xb2   :  { %276 = vadd.xlane.f32.xlu0 %v275_v21 }
  0xb3   :  { %v1235_v18 = vpop.f32.mrf.mxu2  ;;  %v1237_v19 = vpop.f32.mrf.mxu0 }
  0xb4   :  { %v649_v20 = vsel %vm255_vm2, %v1235_v18, 0.0  ;;  %v636_v22 = vsel %vm255_vm2, %v1237_v19, 0.0  ;;  %v1245_v23 = vpop.f32.mrf.mxu3  ;;  %v1247_v24 = vpop.f32.mrf.mxu1 }
  0xb5   :  { %650 = vadd.xlane.f32.xlu1 %v649_v20  ;;  %637 = vadd.xlane.f32.xlu2 %v636_v22  ;;  %v644_v26 = vsel %vm255_vm2, %v1247_v24, 0.0  ;;  %v657_v31 = vsel %vm255_vm2, %v1245_v23, 0.0 }
  0xba   :  { %642 = vadd.xlane.f32.xlu0 %v641_v27 }
  0xbb   :  { %v1249_v25 = vpop.f32.mrf.mxu2 }
  0xbc   :  { %v652_v28 = vsel %vm255_vm2, %v1249_v25, 0.0  ;;  %v1257_v29 = vpop.f32.mrf.mxu3 }
  0xbd   :  { %645 = vadd.xlane.f32.xlu1 %v644_v26  ;;  %653 = vadd.xlane.f32.xlu2 %v652_v28  ;;  %v660_v30 = vsel %vm255_vm2, %v1257_v29, 0.0 }
  0xc2   :  { %661 = vadd.xlane.f32.xlu0 %v660_v30 }
  0xc5   :  { %284 = vadd.xlane.f32.xlu1 %v283_v32  ;;  %658 = vadd.xlane.f32.xlu2 %v657_v31 }
 0x10c   :  { %v258_v33 = vpop.xlane.xlu0 %257 }
 0x10d   :  { %v266_v34 = vpop.xlane.xlu1 %265 }
 0x10e   :  { %v270_v35 = vadd.f32 %v266_v34, %v258_v33 }
 0x114   :  { %v274_v36 = vpop.xlane.xlu2 %273 }
 0x115   :  { %v278_v37 = vadd.f32 %v274_v36, %v270_v35  ;;  %v282_v38 = vpop.xlane.xlu0 %281  ;;  %v269_v43 = vpop.xlane.xlu1 %268 }
 0x117   :  { %v286_v39 = vadd.f32 %v282_v38, %v278_v37 }
 0x119   :  { %v1265_v40 = vmul.f32 0.0078125, %v286_v39 }
 0x11b   :  { %v290_v41 = vsub.f32 %v1201_v1, %v1265_v40  ;;  %v302_v42 = vsub.f32 %v1203_v2, %v1265_v40  ;;  %v326_v50 = vsub.f32 %v1215_v8, %v1265_v40  ;;  %v314_v51 = vsub.f32 %v1209_v5, %v1265_v40 }
 0x11d   :  { %v292_v44 = vmul.f32 %v290_v41, %v290_v41  ;;  %v304_v45 = vmul.f32 %v302_v42, %v302_v42  ;;  %v261_v46 = vpop.xlane.xlu0 %260  ;;  %v328_v52 = vmul.f32 %v326_v50, %v326_v50  ;;  %v316_v53 = vmul.f32 %v314_v51, %v314_v51 }
 0x11e   :  { %v271_v0 = vadd.f32 %v269_v43, %v261_v46 }
 0x11f   :  { %v294_v48 = vsel %vm255_vm2, %v292_v44, 0.0  ;;  %v306_v49 = vsel %vm255_vm2, %v304_v45, 0.0  ;;  %v330_v57 = vsel %vm255_vm2, %v328_v52, 0.0  ;;  %v318_v58 = vsel %vm255_vm2, %v316_v53, 0.0 }
 0x120   :  { %v635_v47 = vpop.xlane.xlu2 %634  ;;  %295 = vadd.xlane.f32.xlu1 %v294_v48  ;;  %307 = vadd.xlane.f32.xlu0 %v306_v49 }
 0x125   :  { %v277_v55 = vpop.xlane.xlu0 %276 }
 0x126   :  { %v279_v3 = vadd.f32 %v277_v55, %v271_v0 }
 0x128   :  { %v651_v54 = vpop.xlane.xlu1 %650  ;;  %v638_v56 = vpop.xlane.xlu2 %637  ;;  %331 = vadd.xlane.f32.xlu1 %v330_v57  ;;  %319 = vadd.xlane.f32.xlu0 %v318_v58 }
 0x12d   :  { %v643_v60 = vpop.xlane.xlu0 %642 }
 0x12e   :  { %v647_v63 = vadd.f32 %v643_v60, %v635_v47 }
 0x130   :  { %v646_v59 = vpop.xlane.xlu1 %645  ;;  %v654_v61 = vpop.xlane.xlu2 %653  ;;  %v655_v11 = vadd.f32 %v651_v54, %v647_v63 }
 0x131   :  { %v648_v62 = vadd.f32 %v646_v59, %v638_v56 }
 0x133   :  { %v656_v4 = vadd.f32 %v654_v61, %v648_v62 }
 0x135   :  { %v662_v10 = vpop.xlane.xlu0 %661 }
 0x136   :  { %v664_v15 = vadd.f32 %v662_v10, %v656_v4  ;;  %v1021_v10 = vmov 0  }
 0x137   :  { %1010 = vset.pattern.permute.xlu2 %v1021_v10  ;;  %1012 = vset.pattern.permute.xlu1 %v1021_v10 }
 0x138   :  { %v285_v6 = vpop.xlane.xlu1 %284  ;;  %v659_v20 = vpop.xlane.xlu2 %658  ;;  %v1281_v26 = vmul.f32 0.0078125, %v664_v15  ;;  %1011 = vset.pattern.permute.xlu0 %v1021_v10 }
 0x139   :  { %v287_v14 = vadd.f32 %v285_v6, %v279_v3  ;;  %v663_v21 = vadd.f32 %v659_v20, %v655_v11 }
 0x13a   :  { %v668_v31 = vsub.f32 %v1237_v19, %v1281_v26  ;;  %v692_v41 = vsub.f32 %v1249_v25, %v1281_v26  ;;  %v704_v56 = vsub.f32 %v1257_v29, %v1281_v26  ;;  %v680_v57 = vsub.f32 %v1247_v24, %v1281_v26 }
 0x13b   :  { %v1279_v22 = vmul.f32 0.0078125, %v287_v14  ;;  %v1283_v27 = vmul.f32 0.0078125, %v663_v21 }
 0x13c   :  { %v670_v34 = vmul.f32 %v668_v31, %v668_v31  ;;  %v694_v44 = vmul.f32 %v692_v41, %v692_v41  ;;  %v706_v59 = vmul.f32 %v704_v56, %v704_v56  ;;  %v682_v60 = vmul.f32 %v680_v57, %v680_v57 }
 0x13d   :  { %v303_v28 = vsub.f32 %v1217_v9, %v1279_v22  ;;  %v291_v30 = vsub.f32 %v1213_v7, %v1279_v22  ;;  %v315_v35 = vsub.f32 %v1223_v12, %v1279_v22  ;;  %v667_v39 = vsub.f32 %v1225_v13, %v1283_v27 }
 0x13e   :  { %v674_v38 = vsel %vm255_vm2, %v670_v34, 0.0  ;;  %v679_v47 = vsub.f32 %v1233_v17, %v1283_v27  ;;  %v691_v48 = vsub.f32 %v1235_v18, %v1283_v27  ;;  %v698_v49 = vsel %vm255_vm2, %v694_v44, 0.0  ;;  %v1327_v44 = vld [vmem:[%s1379_s6] sm:$0xff] }
 0x13f   :  { %v305_v32 = vmul.f32 %v303_v28, %v303_v28  ;;  %v293_v33 = vmul.f32 %v291_v30, %v291_v30  ;;  %675 = vadd.xlane.f32.xlu0 %v674_v38  ;;  %v317_v42 = vmul.f32 %v315_v35, %v315_v35  ;;  %v669_v43 = vmul.f32 %v667_v39, %v667_v39  ;;  %v29_v38 = vld [vmem:[%s1378_s5] sm:$0xff] }
 0x140   :  { %v703_v50 = vsub.f32 %v1245_v23, %v1283_v27  ;;  %v681_v51 = vmul.f32 %v679_v47, %v679_v47  ;;  %v693_v52 = vmul.f32 %v691_v48, %v691_v48  ;;  %v710_v61 = vsel %vm255_vm2, %v706_v59, 0.0 }
 0x141   :  { %v309_v36 = vsel %vm255_vm2, %v305_v32, 0.0  ;;  %v297_v37 = vsel %vm255_vm2, %v293_v33, 0.0  ;;  %v321_v45 = vsel %vm255_vm2, %v317_v42, 0.0  ;;  %v671_v46 = vsel %vm255_vm2, %v669_v43, 0.0 }
 0x142   :  { %310 = vadd.xlane.f32.xlu1 %v309_v36  ;;  %298 = vadd.xlane.f32.xlu2 %v297_v37  ;;  %v705_v53 = vmul.f32 %v703_v50, %v703_v50  ;;  %v683_v54 = vsel %vm255_vm2, %v681_v51, 0.0  ;;  %v695_v55 = vsel %vm255_vm2, %v693_v52, 0.0  ;;  %v686_v62 = vsel %vm255_vm2, %v682_v60, 0.0 }
 0x143   :  { %v327_v63 = vsub.f32 %v1231_v16, %v1279_v22 }
 0x144   :  { %v707_v58 = vsel %vm255_vm2, %v705_v53, 0.0 }
 0x145   :  { %v329_v0 = vmul.f32 %v327_v63, %v327_v63 }
 0x147   :  { %699 = vadd.xlane.f32.xlu0 %v698_v49  ;;  %v333_v3 = vsel %vm255_vm2, %v329_v0, 0.0 }
 0x14a   :  { %322 = vadd.xlane.f32.xlu1 %v321_v45  ;;  %672 = vadd.xlane.f32.xlu2 %v671_v46 }
 0x14f   :  { %708 = vadd.xlane.f32.xlu0 %v707_v58 }
 0x152   :  { %684 = vadd.xlane.f32.xlu1 %v683_v54  ;;  %696 = vadd.xlane.f32.xlu2 %v695_v55 }
 0x15a   :  { %711 = vadd.xlane.f32.xlu1 %v710_v61  ;;  %687 = vadd.xlane.f32.xlu2 %v686_v62 }
 0x162   :  { %334 = vadd.xlane.f32.xlu2 %v333_v3 }
 0x193   :  { %v296_v4 = vpop.xlane.xlu1 %295  ;;  %v308_v6 = vpop.xlane.xlu0 %307 }
 0x194   :  { %v312_v11 = vadd.f32 %v308_v6, %v296_v4 }
 0x19b   :  { %v320_v14 = vpop.xlane.xlu0 %319  ;;  %v332_v20 = vpop.xlane.xlu1 %331 }
 0x19c   :  { %v324_v15 = vadd.f32 %v320_v14, %v312_v11 }
 0x19e   :  { %v336_v21 = vadd.f32 %v332_v20, %v324_v15 }
 0x1a0   :  { %v338_v28 = vmul.f32 0.0078125, %v336_v21 }
 0x1a2   :  { %v340_v30 = vadd.f32 1e-05, %v338_v28 }
 0x1a4   :  { %1013 = vrsqrt.f32 %v340_v30  ;;  %vm348_vm4 = vweird.f32 %v340_v30 }
 0x1aa   :  { %v1014_v31 = vpop.eup %1013 }
 0x1ab   :  { %v343_v32 = vmul.f32 %v1014_v31, %v340_v30  ;;  %vm349_vm3 = vweird.f32 %v1014_v31 }
 0x1ac   :  { %vm350_vm5 = vmor %vm348_vm4, %vm349_vm3 }
 0x1ad   :  { %v344_v33 = vmul.f32 %v1014_v31, %v343_v32 }
 0x1af   :  { %v345_v34 = vmul.f32 0.5, %v344_v33 }
 0x1b1   :  { %v346_v35 = vsub.f32 1.5, %v345_v34 }
 0x1b2   :  { %v676_v41 = vpop.xlane.xlu0 %675 }
 0x1b3   :  { %v347_v39 = vmul.f32 %v1014_v31, %v346_v35 }
 0x1b5   :  { %v311_v36 = vpop.xlane.xlu1 %310  ;;  %v299_v37 = vpop.xlane.xlu2 %298  ;;  %v351_v42 = vsel %vm350_vm5, %v1014_v31, %v347_v39 }
 0x1b6   :  { %v362_v43 = vmul.f32 %v351_v42, %v29_v38 }
 0x1b8   :  { %370 = vperm.xlu2 %1010, %v362_v43   ;;  %v364_v45 = vmul.f32 %v362_v43, %v1265_v40  ;;  %v313_v40 = vadd.f32 %v311_v36, %v299_v37 }
 0x1ba   :  { %v366_v46 = vsub.f32 %v1327_v44, %v364_v45  ;;  %v700_v49 = vpop.xlane.xlu0 %699  ;;  %v30_v45 = vld [vmem:[%s1378_s5 + $0x8] sm:$0xff] }
 0x1bc   :  { %382 = vperm.xlu1 %1012, %v366_v46  }
 0x1bd   :  { %v323_v47 = vpop.xlane.xlu1 %322  ;;  %v673_v48 = vpop.xlane.xlu2 %672 }
 0x1be   :  { %v325_v63 = vadd.f32 %v323_v47, %v313_v40 }
 0x1c2   :  { %v709_v54 = vpop.xlane.xlu0 %708 }
 0x1c5   :  { %v685_v50 = vpop.xlane.xlu1 %684  ;;  %v697_v51 = vpop.xlane.xlu2 %696 }
 0x1c6   :  { %v689_v52 = vadd.f32 %v685_v50, %v673_v48 }
 0x1c8   :  { %v701_v53 = vadd.f32 %v697_v51, %v689_v52 }
 0x1ca   :  { %v713_v55 = vadd.f32 %v709_v54, %v701_v53  ;;  %v32_v54 = vld [vmem:[%s1379_s6 + $0x8] sm:$0xff] }
 0x1cc   :  { %v715_v56 = vmul.f32 0.0078125, %v713_v55 }
 0x1cd   :  { %v688_v57 = vpop.xlane.xlu2 %687  ;;  %v712_v61 = vpop.xlane.xlu1 %711 }
 0x1ce   :  { %v717_v58 = vadd.f32 1e-05, %v715_v56  ;;  %v690_v59 = vadd.f32 %v688_v57, %v676_v41 }
 0x1d0   :  { %1015 = vrsqrt.f32 %v717_v58  ;;  %v702_v60 = vadd.f32 %v700_v49, %v690_v59  ;;  %vm725_vm7 = vweird.f32 %v717_v58 }
 0x1d2   :  { %v714_v62 = vadd.f32 %v712_v61, %v702_v60 }
 0x1d4   :  { %v716_v0 = vmul.f32 0.0078125, %v714_v62 }
 0x1d5   :  { %v335_v3 = vpop.xlane.xlu2 %334 }
 0x1d6   :  { %v1016_v4 = vpop.eup %1015  ;;  %v718_v6 = vadd.f32 1e-05, %v716_v0  ;;  %v337_v10 = vadd.f32 %v335_v3, %v325_v63 }
 0x1d7   :  { %v720_v11 = vmul.f32 %v1016_v4, %v717_v58  ;;  %vm726_vm6 = vweird.f32 %v1016_v4 }
 0x1d8   :  { %1017 = vrsqrt.f32 %v718_v6  ;;  %v339_v14 = vmul.f32 0.0078125, %v337_v10  ;;  %vm727_vm8 = vmor %vm725_vm7, %vm726_vm6  ;;  %vm735_vm10 = vweird.f32 %v718_v6 }
 0x1d9   :  { %v721_v15 = vmul.f32 %v1016_v4, %v720_v11 }
 0x1da   :  { %v341_v20 = vadd.f32 1e-05, %v339_v14 }
 0x1db   :  { %v722_v21 = vmul.f32 0.5, %v721_v15 }
 0x1dc   :  { %1019 = vrsqrt.f32 %v341_v20  ;;  %vm358_vm13 = vweird.f32 %v341_v20 }
 0x1dd   :  { %v723_v28 = vsub.f32 1.5, %v722_v21 }
 0x1de   :  { %v1018_v30 = vpop.eup %1017 }
 0x1df   :  { %v730_v31 = vmul.f32 %v1018_v30, %v718_v6  ;;  %v724_v32 = vmul.f32 %v1016_v4, %v723_v28  ;;  %vm736_vm9 = vweird.f32 %v1018_v30 }
 0x1e0   :  { %vm737_vm11 = vmor %vm735_vm10, %vm736_vm9 }
 0x1e1   :  { %v731_v33 = vmul.f32 %v1018_v30, %v730_v31  ;;  %v728_v34 = vsel %vm727_vm8, %v1016_v4, %v724_v32 }
 0x1e2   :  { %v1020_v35 = vpop.eup %1019  ;;  %v739_v36 = vmul.f32 %v728_v34, %v29_v38 }
 0x1e3   :  { %v353_v37 = vmul.f32 %v1020_v35, %v341_v20  ;;  %v732_v39 = vmul.f32 0.5, %v731_v33  ;;  %vm359_vm12 = vweird.f32 %v1020_v35 }
 0x1e4   :  { %747 = vperm.xlu2 %1010, %v739_v36   ;;  %vm360_vm14 = vmor %vm358_vm13, %vm359_vm12  ;;  %v741_v52 = vmul.f32 %v739_v36, %v1283_v27 }
 0x1e5   :  { %v354_v41 = vmul.f32 %v1020_v35, %v353_v37  ;;  %v733_v42 = vsub.f32 1.5, %v732_v39 }
 0x1e6   :  { %v743_v56 = vsub.f32 %v1327_v44, %v741_v52 }
 0x1e7   :  { %v355_v43 = vmul.f32 0.5, %v354_v41  ;;  %v734_v46 = vmul.f32 %v1018_v30, %v733_v42 }
 0x1e9   :  { %v356_v47 = vsub.f32 1.5, %v355_v43  ;;  %v738_v48 = vsel %vm737_vm11, %v1018_v30, %v734_v46 }
 0x1ea   :  { %v740_v49 = vmul.f32 %v738_v48, %v30_v45 }
 0x1eb   :  { %v357_v38 = vmul.f32 %v1020_v35, %v356_v47 }
 0x1ec   :  { %752 = vperm.xlu2 %1010, %v740_v49   ;;  %v742_v57 = vmul.f32 %v740_v49, %v1281_v26 }
 0x1ed   :  { %v361_v50 = vsel %vm360_vm14, %v1020_v35, %v357_v38 }
 0x1ee   :  { %v363_v51 = vmul.f32 %v361_v50, %v30_v45  ;;  %v744_v58 = vsub.f32 %v32_v54, %v742_v57 }
 0x1f0   :  { %375 = vperm.xlu0 %1011, %v363_v51   ;;  %v365_v53 = vmul.f32 %v363_v51, %v1279_v22 }
 0x1f2   :  { %v367_v55 = vsub.f32 %v32_v54, %v365_v53 }
 0x1f4   :  { %387 = vperm.xlu1 %1012, %v367_v55   ;;  %759 = vperm.xlu2 %1010, %v743_v56  }
 0x1fc   :  { %764 = vperm.xlu1 %1012, %v744_v58  }
 0x212   :  { %v371_v59 = vpop.permute.xlu2 %370 }
 0x213   :  { %v378_v60 = vmul.f32 %v371_v59, %v1201_v1  ;;  %v392_v27 = vmul.f32 %v371_v59, %v1203_v2  ;;  %v396_v22 = vmul.f32 %v371_v59, %v1209_v5  ;;  %v400_v61 = vmul.f32 %v371_v59, %v1215_v8 }
 0x22e   :  { %v383_v40 = vpop.permute.xlu1 %382 }
 0x22f   :  { %v390_v62 = vadd.f32 %v383_v40, %v378_v60  ;;  %v394_v63 = vadd.f32 %v392_v27, %v383_v40  ;;  %v398_v0 = vadd.f32 %v396_v22, %v383_v40  ;;  %v402_v44 = vadd.f32 %v400_v61, %v383_v40 }
 0x231   :  { %v404_v3 = vmax.f32 %v390_v62, %v394_v63  ;;  %v406_v4 = vmax.f32 %v398_v0, %v402_v44 }
 0x233   :  { %v408_v6 = vmax.f32 %v404_v3, %v406_v4 }
 0x235   :  { %v410_v26 = vmax.f32 %v408_v6, 0.0 }
 0x237   :  { %v412_v10 = vpack.c.bf16 %v410_v26, %v410_v26 }
 0x239   :  { %415 = vst.msk [vmem:[%s1380_s7] sm:$0xf] %vm414_vm15, %v412_v10 }
 0x23e   :  { %v748_v1 = vpop.permute.xlu2 %747 }
 0x23f   :  { %v755_v5 = vmul.f32 %v748_v1, %v1225_v13  ;;  %v769_v8 = vmul.f32 %v748_v1, %v1233_v17  ;;  %v773_v11 = vmul.f32 %v748_v1, %v1235_v18  ;;  %v777_v14 = vmul.f32 %v748_v1, %v1245_v23 }
 0x246   :  { %v753_v2 = vpop.permute.xlu2 %752 }
 0x247   :  { %v756_v49 = vmul.f32 %v753_v2, %v1237_v19  ;;  %v770_v38 = vmul.f32 %v753_v2, %v1247_v24 }
 0x24e   :  { %v760_v15 = vpop.permute.xlu2 %759 }
 0x24f   :  { %v767_v20 = vadd.f32 %v760_v15, %v755_v5  ;;  %v771_v21 = vadd.f32 %v769_v8, %v760_v15  ;;  %v775_v28 = vadd.f32 %v773_v11, %v760_v15  ;;  %v779_v30 = vadd.f32 %v777_v14, %v760_v15 }
 0x251   :  { %v781_v31 = vmax.f32 %v767_v20, %v771_v21  ;;  %v783_v32 = vmax.f32 %v775_v28, %v779_v30 }
 0x253   :  { %v785_v33 = vmax.f32 %v781_v31, %v783_v32 }
 0x255   :  { %v787_v34 = vmax.f32 %v785_v33, 0.0 }
 0x257   :  { %v789_v35 = vpack.c.bf16 %v787_v34, %v787_v34 }
 0x259   :  { %974 = vst.msk [vmem:[%s1380_s7 + $0x8] sm:$0xf] %vm414_vm15, %v789_v35 }
 0x262   :  { %v376_v13 = vpop.permute.xlu0 %375 }
 0x263   :  { %v379_v17 = vmul.f32 %v376_v13, %v1213_v7  ;;  %v393_v18 = vmul.f32 %v376_v13, %v1217_v9  ;;  %v397_v23 = vmul.f32 %v376_v13, %v1223_v12  ;;  %v401_v36 = vmul.f32 %v376_v13, %v1231_v16 }
 0x264   :  { %v774_v7 = vmul.f32 %v753_v2, %v1249_v25  ;;  %v778_v12 = vmul.f32 %v753_v2, %v1257_v29 }
 0x266   :  { %v388_v37 = vpop.permute.xlu1 %387 }
 0x267   :  { %v391_v39 = vadd.f32 %v388_v37, %v379_v17  ;;  %v395_v41 = vadd.f32 %v393_v18, %v388_v37  ;;  %v399_v42 = vadd.f32 %v397_v23, %v388_v37  ;;  %v403_v43 = vadd.f32 %v401_v36, %v388_v37 }
 0x269   :  { %v405_v45 = vmax.f32 %v391_v39, %v395_v41  ;;  %v407_v46 = vmax.f32 %v399_v42, %v403_v43 }
 0x26b   :  { %v409_v47 = vmax.f32 %v405_v45, %v407_v46 }
 0x26d   :  { %v411_v48 = vmax.f32 %v409_v47, 0.0 }
 0x26e   :  { %v765_v9 = vpop.permute.xlu1 %764 }
 0x26f   :  { %v413_v50 = vpack.c.bf16 %v411_v48, %v411_v48  ;;  %v768_v16 = vadd.f32 %v765_v9, %v756_v49  ;;  %v772_v51 = vadd.f32 %v770_v38, %v765_v9  ;;  %v776_v52 = vadd.f32 %v774_v7, %v765_v9 }
 0x270   :  { %v780_v53 = vadd.f32 %v778_v12, %v765_v9 }
 0x271   :  { %416 = vst.msk [vmem:[%s1380_s7 + $0x4] sm:$0xf] %vm414_vm15, %v413_v50  ;;  %v782_v54 = vmax.f32 %v768_v16, %v772_v51 }
 0x272   :  { %v784_v55 = vmax.f32 %v776_v52, %v780_v53 }
 0x274   :  { %v786_v19 = vmax.f32 %v782_v54, %v784_v55 }
 0x276   :  { %v788_v56 = vmax.f32 %v786_v19, 0.0 }
 0x278   :  { %v790_v24 = vpack.c.bf16 %v788_v56, %v788_v56 }
 0x27a   :  { %975 = vst.msk [vmem:[%s1380_s7 + $0xc] sm:$0xf] %vm414_vm15, %v790_v24 }

// kernel: siamese_forward.5
= control target key start
LH: loop header
LB: loop body
LE: loop exit
PB: predicated region body
PF: predicated region fallthrough
CT: control target
= control target key end

     0   :  { %vm287_vm8 = vcmask 261120   ;;  %vm323_vm12 = vcmask 1024   ;;  %s537_s1 = inlined_call_operand.vmem [shape: bf16[256,32], index: 1, kind: input, shape index: {}]   ;;  %s538_s0 = inlined_call_operand.vmem [shape: bf16[2,2,256], index: 0, kind: input, shape index: {}]   ;;  %s539_s2 = inlined_call_operand.vmem [shape: f32[1,32], index: 2, kind: input, shape index: {}]   ;;  %s540_s3 = inlined_call_operand.vmem [shape: bf16[32,1], index: 3, kind: input, shape index: {}]   ;;  %s541_s4 = inlined_call_operand.<no memory space> [shape: f32[1,1], index: 4, kind: input, shape index: {}]   ;;  %s542_s5 = inlined_call_operand.vmem [shape: f32[2,1], index: 5, kind: output, shape index: {}]  }
   0x1   :  { %v413_v0 = vld [vmem:[%s537_s1 + $0x38] sm:$0xff]  ;;  %v412_v2 = vld [vmem:[%s537_s1 + $0x30] sm:$0xff]  ;;  %v23_v4 = vld [vmem:[%s538_s0] sm:$0x3]  ;;  %v10_v41 = vstv %s541_s4 }
   0x2   :  { %v421_v1 = vld [vmem:[%s537_s1 + $0x78] sm:$0xff]  ;;  %162 = vmatpush.bf16.msra.mxu0 %v413_v0  ;;  %v420_v3 = vld [vmem:[%s537_s1 + $0x70] sm:$0xff]  ;;  %217 = vmatpush.bf16.msra.mxu2 %v413_v0  ;;  %v411_v5 = vld [vmem:[%s537_s1 + $0x28] sm:$0xff]  ;;  %61 = vst [vmem:[#allocation1] ss:$9 sm:$0xff] %v23_v4 }
   0x3   :  { %175 = vmatpush.bf16.msra.mxu1 %v421_v1  ;;  %230 = vmatpush.bf16.msra.mxu3 %v421_v1  ;;  %v419_v6 = vld [vmem:[%s537_s1 + $0x68] sm:$0xff]  ;;  %v410_v7 = vld [vmem:[%s537_s1 + $0x20] sm:$0xff]  ;;  %v409_v12 = vld [vmem:[%s537_s1 + $0x18] sm:$0xff]  ;;  %11 = vst [vmem:[#allocation2] sm:$0x1] %v10_v41 }
   0x4   :  { %v418_v8 = vld [vmem:[%s537_s1 + $0x60] sm:$0xff]  ;;  %v417_v13 = vld [vmem:[%s537_s1 + $0x58] sm:$0xff]  ;;  %v408_v14 = vld [vmem:[%s537_s1 + $0x10] sm:$0xff] }
   0x5   :  { %v394_v9 = vld [vmem:[%s538_s0 + $0x2] sm:$0x3]  ;;  %v416_v15 = vld [vmem:[%s537_s1 + $0x50] sm:$0xff]  ;;  %v407_v16 = vld [vmem:[%s537_s1 + $0x8] sm:$0xff] }
   0x6   :  { %163 = vmatpush.bf16.msra.mxu0 %v412_v2  ;;  %218 = vmatpush.bf16.msra.mxu2 %v412_v2  ;;  %v415_v17 = vld [vmem:[%s537_s1 + $0x48] sm:$0xff]  ;;  %v406_v18 = vld [vmem:[%s537_s1] sm:$0xff] }
   0x7   :  { %176 = vmatpush.bf16.msra.mxu1 %v420_v3  ;;  %231 = vmatpush.bf16.msra.mxu3 %v420_v3  ;;  %v414_v19 = vld [vmem:[%s537_s1 + $0x40] sm:$0xff]  ;;  %v423_v26 = vld [vmem:[%s540_s3 + $0x8] sm:$0xff] }
   0x8   :  { %v424_v22 = vld [vmem:[%s539_s2] ss:$0 sm:$0xff] }
   0x9   :  { %v62_v10 = vld [vmem:[#allocation1] sm:$0xff]  ;;  %v63_v11 = vld [vmem:[#allocation1 + $0x9] sm:$0xff] }
   0xa   :  { %164 = vmatpush.bf16.msra.mxu0 %v411_v5  ;;  %219 = vmatpush.bf16.msra.mxu2 %v411_v5  ;;  %212 = vst [vmem:[#allocation1] ss:$9 sm:$0xff] %v394_v9  ;;  %v422_v28 = vld [vmem:[%s540_s3] sm:$0xff] }
   0xb   :  { %177 = vmatpush.bf16.msra.mxu1 %v419_v6  ;;  %232 = vmatpush.bf16.msra.mxu3 %v419_v6 }
   0xe   :  { %165 = vmatpush.bf16.msra.mxu0 %v410_v7  ;;  %220 = vmatpush.bf16.msra.mxu2 %v410_v7  ;;  %v425_v7 = vld [vmem:[#allocation2] ss:$0 sm:$0xff] }
   0xf   :  { %178 = vmatpush.bf16.msra.mxu1 %v418_v8  ;;  %233 = vmatpush.bf16.msra.mxu3 %v418_v8 }
  0x11   :  { %v213_v20 = vld [vmem:[#allocation1] sm:$0xff]  ;;  %v214_v21 = vld [vmem:[#allocation1 + $0x9] sm:$0xff] }
  0x12   :  { %166 = vmatpush.bf16.msra.mxu0 %v409_v12  ;;  %221 = vmatpush.bf16.msra.mxu2 %v409_v12 }
  0x13   :  { %179 = vmatpush.bf16.msra.mxu1 %v417_v13  ;;  %234 = vmatpush.bf16.msra.mxu3 %v417_v13 }
  0x16   :  { %167 = vmatpush.bf16.msra.mxu0 %v408_v14  ;;  %222 = vmatpush.bf16.msra.mxu2 %v408_v14 }
  0x17   :  { %180 = vmatpush.bf16.msra.mxu1 %v416_v15  ;;  %235 = vmatpush.bf16.msra.mxu3 %v416_v15 }
  0x1a   :  { %168 = vmatpush.bf16.msra.mxu0 %v407_v16  ;;  %223 = vmatpush.bf16.msra.mxu2 %v407_v16 }
  0x1b   :  { %181 = vmatpush.bf16.msra.mxu1 %v415_v17  ;;  %236 = vmatpush.bf16.msra.mxu3 %v415_v17 }
  0x1e   :  { %169 = vmatpush.bf16.msra.mxu0 %v406_v18  ;;  %224 = vmatpush.bf16.msra.mxu2 %v406_v18 }
  0x1f   :  { %182 = vmatpush.bf16.msra.mxu1 %v414_v19  ;;  %237 = vmatpush.bf16.msra.mxu3 %v414_v19 }
  0x21   :  { %170 = vmatmul.bf16.vlgmr.msra.gmra.mxu0 %v62_v10  ;;  %225 = vmatmul.bf16.vlgmr.msra.gmra.mxu2 %v213_v20 }
  0x22   :  { %183 = vmatmul.bf16.vlgmr.msra.gmra.mxu1 %v63_v11  ;;  %238 = vmatmul.bf16.vlgmr.msra.gmra.mxu3 %v214_v21 }
  0x23   :  { %297 = vmatpush.bf16.msrb.mxu0 %v423_v26 }
  0x27   :  { %298 = vmatpush.bf16.msrb.mxu0 %v422_v28 }
  0x9e   :  { %v171_v23 = vpop.f32.mrf.mxu0 }
  0x9f   :  { %v184_v24 = vpop.f32.mrf.mxu1  ;;  %v172_v25 = vadd.f32 %v424_v22, %v171_v23 }
  0xa1   :  { %v185_v27 = vadd.f32 %v184_v24, %v172_v25 }
  0xa3   :  { %v393_v29 = vmul.f32 -1.442695, %v185_v27 }
  0xa4   :  { %v226_v30 = vpop.f32.mrf.mxu2 }
  0xa5   :  { %426 = vpow2.f32 %v393_v29  ;;  %v239_v31 = vpop.f32.mrf.mxu3  ;;  %v227_v32 = vadd.f32 %v424_v22, %v226_v30 }
  0xa6   :  { %v173_v33 = vpop.f32.mrf.mxu0 }
  0xa7   :  { %v186_v34 = vpop.f32.mrf.mxu1  ;;  %v240_v35 = vadd.f32 %v239_v31, %v227_v32 }
  0xa9   :  { %v395_v36 = vmul.f32 -1.442695, %v240_v35 }
  0xab   :  { %v427_v37 = vpop.eup %426  ;;  %428 = vpow2.f32 %v395_v36 }
  0xac   :  { %v191_v38 = vadd.f32 1.0, %v427_v37  ;;  %v228_v39 = vpop.f32.mrf.mxu2 }
  0xad   :  { %v241_v40 = vpop.f32.mrf.mxu3 }
  0xae   :  { %430 = vrcp.f32 %v191_v38  ;;  %vm197_vm0 = vweird.f32 %v191_v38  ;;  %v203_v49 = vand.u32 2147483648, %v191_v38  ;;  %v201_v52 = vand.u32 2147483647, %v191_v38 }
  0xb0   :  { %v204_v56 = vor.u32 1.1754944e-38, %v203_v49  ;;  %vm202_vm3 = vcmp.eq.f32.partialorder %v201_v52, 8.507059e+37 }
  0xb1   :  { %v429_v42 = vpop.eup %428 }
  0xb2   :  { %v246_v43 = vadd.f32 1.0, %v429_v42 }
  0xb4   :  { %v431_v44 = vpop.eup %430  ;;  %432 = vrcp.f32 %v246_v43  ;;  %v258_v55 = vand.u32 2147483648, %v246_v43  ;;  %v256_v58 = vand.u32 2147483647, %v246_v43  ;;  %vm252_vm5 = vweird.f32 %v246_v43 }
  0xb5   :  { %v193_v45 = vmul.f32 %v431_v44, %v191_v38  ;;  %vm198_vm1 = vweird.f32 %v431_v44 }
  0xb6   :  { %vm199_vm2 = vmor %vm197_vm0, %vm198_vm1  ;;  %v259_v61 = vor.u32 1.1754944e-38, %v258_v55  ;;  %vm257_vm7 = vcmp.eq.f32.partialorder %v256_v58, 8.507059e+37 }
  0xb7   :  { %v194_v46 = vsub.f32 1.0, %v193_v45 }
  0xb9   :  { %v195_v47 = vmul.f32 %v431_v44, %v194_v46 }
  0xba   :  { %v433_v48 = vpop.eup %432 }
  0xbb   :  { %v196_v50 = vadd.f32 %v431_v44, %v195_v47  ;;  %v248_v51 = vmul.f32 %v433_v48, %v246_v43  ;;  %vm253_vm4 = vweird.f32 %v433_v48 }
  0xbc   :  { %vm254_vm6 = vmor %vm252_vm5, %vm253_vm4 }
  0xbd   :  { %v249_v53 = vsub.f32 1.0, %v248_v51  ;;  %v200_v54 = vsel %vm199_vm2, %v431_v44, %v196_v50 }
  0xbe   :  { %v205_v59 = vsel %vm202_vm3, %v204_v56, %v200_v54 }
  0xbf   :  { %v250_v57 = vmul.f32 %v433_v48, %v249_v53  ;;  %v207_v62 = vpack.c.bf16 %v205_v59, %v205_v59 }
  0xc1   :  { %v251_v60 = vadd.f32 %v433_v48, %v250_v57  ;;  %v208_v2 = vunpack.c.l.bf16 %v207_v62 }
  0xc3   :  { %v255_v63 = vsel %vm254_vm6, %v433_v48, %v251_v60 }
  0xc4   :  { %v260_v0 = vsel %vm257_vm7, %v259_v61, %v255_v63 }
  0xc5   :  { %v262_v1 = vpack.c.bf16 %v260_v0, %v260_v0 }
  0xc7   :  { %v263_v3 = vunpack.c.l.bf16 %v262_v1 }
  0xc9   :  { %v264_v4 = vsub.f32 %v208_v2, %v263_v3 }
  0xcb   :  { %v265_v5 = vand.u32 2147483647, %v264_v4 }
  0xcd   :  { %v266_v6 = vpack.c.bf16 %v265_v5, %v265_v5 }
  0xcf   :  { %404 = vmatmul.msk.bf16.vlgmr.msrb.gmra.mxu0 %vm287_vm8, %v266_v6 }
 0x14c   :  { %v300_v8 = vpop.f32.mrf.mxu0 }
 0x14d   :  { %v301_v9 = vadd.f32 %v425_v7, %v300_v8 }
 0x14f   :  { %v405_v10 = vmul.f32 -1.442695, %v301_v9 }
 0x151   :  { %434 = vpow2.f32 %v405_v10 }
 0x154   :  { %v302_v11 = vpop.f32.mrf.mxu0 }
 0x157   :  { %v435_v12 = vpop.eup %434 }
 0x158   :  { %v307_v13 = vadd.f32 1.0, %v435_v12 }
 0x15a   :  { %436 = vrcp.f32 %v307_v13  ;;  %v319_v17 = vand.u32 2147483648, %v307_v13  ;;  %v317_v19 = vand.u32 2147483647, %v307_v13  ;;  %vm313_vm10 = vweird.f32 %v307_v13 }
 0x15c   :  { %v320_v21 = vor.u32 1.1754944e-38, %v319_v17  ;;  %vm318_vm13 = vcmp.eq.f32.partialorder %v317_v19, 8.507059e+37 }
 0x160   :  { %v437_v14 = vpop.eup %436 }
 0x161   :  { %v309_v15 = vmul.f32 %v437_v14, %v307_v13  ;;  %vm314_vm9 = vweird.f32 %v437_v14 }
 0x162   :  { %vm315_vm11 = vmor %vm313_vm10, %vm314_vm9 }
 0x163   :  { %v310_v16 = vsub.f32 1.0, %v309_v15 }
 0x165   :  { %v311_v18 = vmul.f32 %v437_v14, %v310_v16 }
 0x167   :  { %v312_v20 = vadd.f32 %v437_v14, %v311_v18 }
 0x169   :  { %v316_v22 = vsel %vm315_vm11, %v437_v14, %v312_v20 }
 0x16a   :  { %v321_v23 = vsel %vm318_vm13, %v320_v21, %v316_v22 }
 0x16b   :  { %324 = vst.msk [vmem:[%s542_s5] sm:$0x3] %vm323_vm12, %v321_v23 }

</bundles_post_ra>
